<compile_context>
chip_gen: v5e
topology: v5e:2x2
jax: 0.10.0
libtpu: 0.0.40
codegen_flags: <defaults>
</compile_context>

<pallas_src>
import math

import jax
import jax.numpy as jnp
from jax import lax
from jax.experimental import pallas as pl
from jax.experimental.pallas import tpu as pltpu


def _round_up(x: int, m: int) -> int:
    return ((x + m - 1) // m) * m


def _memory_kernel_factory(*, d_e, n_real, tn, tl, kn, learnable_constant,
                           out_dtype):
    inv_sqrt_de = 1.0 / math.sqrt(d_e)
    n_pad = kn * tn

    def kernel(const_ref,                      # SMEM scalar
               mi_ref, qi_ref, mo_ref,         # inputs  (keys, query, values)
               mem_ref, p_ref,                 # outputs (resident over N axis)
               m_run_ref, denom_ref, acc_ref, m_hist_ref):   # VMEM scratch
        n = pl.program_id(2)

        # ---- init the online-softmax state at the start of each (b, l) sweep.
        @pl.when(n == 0)
        def _():
            if learnable_constant:
                # The constant logit row contributes exp(c - c) = 1 to the
                # denominator and seeds the running max with c.
                c = const_ref[0]
                m_run_ref[...] = jnp.zeros_like(m_run_ref) + c
                denom_ref[...] = jnp.ones_like(denom_ref)
            else:
                m_run_ref[...] = jnp.full_like(m_run_ref, -jnp.inf)
                denom_ref[...] = jnp.zeros_like(denom_ref)
            acc_ref[...] = jnp.zeros_like(acc_ref)

        mi = mi_ref[...]          # (TN, D_e)  keys chunk (already transposed)
        qi = qi_ref[...]          # (D_e, TL)  query tile
        mo = mo_ref[...]          # (D_o, TN)  values chunk

        # scores for this chunk: canonical (M,K)x(K,N) MXU matmul, f32 acc.
        s = jnp.dot(mi, qi, preferred_element_type=jnp.float32) * inv_sqrt_de

        if n_pad != n_real:
            # Mask zero-padded N rows so they do not pollute the softmax.
            row = lax.broadcasted_iota(jnp.int32, (tn, tl), 0) + n * tn
            s = jnp.where(row < n_real, s, -jnp.inf)

        # ---- online softmax update over the N axis (flash-attention style).
        m_prev = m_run_ref[...]                                    # (1, TL)
        m_new = jnp.maximum(m_prev, jnp.max(s, axis=0, keepdims=True))
        alpha = jnp.exp(m_prev - m_new)                            # (1, TL)
        e = jnp.exp(s - m_new)                                     # (TN, TL) f32

        denom_ref[...] = denom_ref[...] * alpha + jnp.sum(e, axis=0,
                                                          keepdims=True)
        acc_ref[...] = acc_ref[...] * alpha + jnp.dot(
            mo, e.astype(mo.dtype), preferred_element_type=jnp.float32)

        # Non-final chunks: stash the (not-yet-normalized) probabilities
        # directly in the resident p output block, plus the max they used.
        @pl.when(n < kn - 1)
        def _():
            m_run_ref[...] = m_new
            m_hist_ref[n] = m_new
            p_ref[n] = e.astype(out_dtype)

        # ---- finalize on the last N chunk.
        @pl.when(n == kn - 1)
        def _():
            d = denom_ref[...]
            inv = pl.reciprocal(d, approx=True)
            inv = inv * (2.0 - d * inv)          # one Newton step -> ~f32 exact
            mem_ref[...] = (acc_ref[...] * inv).astype(out_dtype)
            # The last chunk's max IS the final max -> store it normalized
            # directly (no re-read / second rounding for the largest chunk).
            p_ref[kn - 1] = (e * inv).astype(out_dtype)
            for k in range(kn - 1):              # static -> unrolled
                corr = jnp.exp(m_hist_ref[k] - m_new) * inv        # (1, TL)
                p_ref[k] = (p_ref[k].astype(jnp.float32) * corr).astype(
                    out_dtype)

    return kernel


def memory_forward(m_in, m_out, q_in, const, *, learnable_constant=True,
                   tn=None, tl=None):
    """Pallas implementation of Memory.forward.

    Args:
      m_in : (B, D_e, T, H, W)
      m_out: (B, D_o, T, H, W)
      q_in : (B, D_e, H, W)
      const: (1,) scalar parameter (used only if learnable_constant)

    Returns:
      mem: (B, D_o, H, W), p: (B, T*H*W, H*W), p_volume: None
    """
    B, D_e, T, H, W = m_in.shape
    _, D_o, _, _, _ = m_out.shape
    N = T * H * W
    L = H * W
    dtype = m_in.dtype
    out_dtype = dtype                       # no up-cast: bf16 in -> bf16 out
    out_it = jnp.dtype(out_dtype).itemsize
    in_it = jnp.dtype(dtype).itemsize

    # Tile sizes: lane dims are multiples of 128 (lane-dense, unmasked stores).
    if tn is None:
        tn = min(512, _round_up(N, 128))
    tn = _round_up(tn, 128)
    if tl is None:
        tl = min(256, _round_up(L, 128))
        # keep the resident (N_pad x TL) p slab within a modest VMEM budget.
        while tl > 128 and 2 * _round_up(N, tn) * tl * out_it > 24 * 2**20:
            tl -= 128
    tl = _round_up(tl, 128)
    N_pad = _round_up(N, tn)
    L_pad = _round_up(L, tl)
    KN = N_pad // tn
    KL = L_pad // tl

    # Layouts so both MXU matmuls are canonical (M,K)x(K,N); the key transpose
    # is done once by XLA outside the kernel (no in-kernel XLU transposes).
    mi_t = jnp.swapaxes(m_in.reshape(B, D_e, N), 1, 2)       # (B, N, D_e)
    qi = q_in.reshape(B, D_e, L)                             # (B, D_e, L)
    mo = m_out.reshape(B, D_o, N)                            # (B, D_o, N)
    if N_pad != N:
        mi_t = jnp.pad(mi_t, ((0, 0), (0, N_pad - N), (0, 0)))
        mo = jnp.pad(mo, ((0, 0), (0, 0), (0, N_pad - N)))
    if L_pad != L:
        qi = jnp.pad(qi, ((0, 0), (0, 0), (0, L_pad - L)))
    const = jnp.asarray(const, jnp.float32).reshape((1,))

    kernel = _memory_kernel_factory(
        d_e=D_e, n_real=N, tn=tn, tl=tl, kn=KN,
        learnable_constant=learnable_constant, out_dtype=out_dtype)

    in_specs = [
        pl.BlockSpec(memory_space=pltpu.MemorySpace.SMEM),               # const
        pl.BlockSpec((None, tn, D_e), lambda b, l, n: (b, n, 0)),        # keys
        pl.BlockSpec((None, D_e, tl), lambda b, l, n: (b, 0, l)),        # query
        pl.BlockSpec((None, D_o, tn), lambda b, l, n: (b, 0, n)),        # values
    ]
    out_specs = [
        pl.BlockSpec((None, D_o, tl), lambda b, l, n: (b, 0, l)),        # mem
        pl.BlockSpec((None, KN, tn, tl), lambda b, l, n: (b, 0, 0, l)),  # p
    ]
    out_shape = (
        jax.ShapeDtypeStruct((B, D_o, L_pad), out_dtype),
        jax.ShapeDtypeStruct((B, KN, tn, L_pad), out_dtype),
    )
    scratch_shapes = [
        pltpu.VMEM((1, tl), jnp.float32),                  # running max
        pltpu.VMEM((1, tl), jnp.float32),                  # running denominator
        pltpu.VMEM((D_o, tl), jnp.float32),                # mem accumulator
        pltpu.VMEM((max(KN - 1, 1), 1, tl), jnp.float32),  # per-chunk max history
    ]

    vmem_est = (2 * (tn * D_e + D_e * tl + D_o * tn) * in_it     # dbl-buf inputs
                + 2 * (KN * tn * tl + D_o * tl) * out_it         # dbl-buf outputs
                + (D_o * tl + (KN + 2) * tl) * 4                 # scratch
                + 8 * tn * tl * 4)                               # temporaries
    vmem_limit = int(min(100 * 2**20, max(32 * 2**20, 2 * vmem_est)))

    cost = pl.CostEstimate(
        flops=2 * B * N * L * (D_e + D_o),
        transcendentals=B * N * L,
        bytes_accessed=int((m_in.size + m_out.size + q_in.size) * in_it
                           + (B * N * L + B * D_o * L) * out_it),
    )

    mem_flat, p4 = pl.pallas_call(
        kernel,
        out_shape=out_shape,
        grid_spec=pltpu.PrefetchScalarGridSpec(
            num_scalar_prefetch=0,
            grid=(B, KL, KN),
            in_specs=in_specs,
            out_specs=out_specs,
            scratch_shapes=scratch_shapes,
        ),
        compiler_params=pltpu.CompilerParams(
            dimension_semantics=("parallel", "parallel", "arbitrary"),
            vmem_limit_bytes=vmem_limit,
        ),
        cost_estimate=cost,
    )(const, mi_t, qi, mo)

    mem = mem_flat[:, :, :L].reshape(B, D_o, H, W)
    p = p4.reshape(B, N_pad, L_pad)[:, :N, :L]
    p_volume = None
    return mem, p, p_volume


def _reference_forward(m_in, m_out, q_in, const, learnable_constant=True):
    """Pure-JAX reference mirroring the PyTorch code."""
    B, D_e, T, H, W = m_in.shape
    _, D_o, _, _, _ = m_out.shape
    mi = jnp.transpose(m_in.reshape(B, D_e, T * H * W), (0, 2, 1))
    qi = q_in.reshape(B, D_e, H * W)
    p = jnp.einsum("bnd,bdl->bnl", mi, qi) / math.sqrt(D_e)
    if learnable_constant:
        const_row = jnp.broadcast_to(const.reshape(1, 1, 1), (B, 1, H * W))
        p = jnp.concatenate([p, const_row], axis=1)
    p = jax.nn.softmax(p, axis=1)
    if learnable_constant:
        p = p[:, :-1, :]
    mo = m_out.reshape(B, D_o, T * H * W)
    mem = jnp.einsum("bdn,bnl->bdl", mo, p).reshape(B, D_o, H, W)
    return mem, p, None


if __name__ == "__main__":
    # Small deterministic shapes consistent with the module.  Chosen so that
    # both N (=432) and L (=144) need padding and multiple tiles, exercising
    # the online-softmax chunking, the padded-row masking and the KL>1 path.
    B, D_e, D_o, T, H, W = 2, 16, 32, 3, 12, 12

    key = jax.random.PRNGKey(0)
    k1, k2, k3 = jax.random.split(key, 3)
    m_in = jax.random.normal(k1, (B, D_e, T, H, W), dtype=jnp.float32)
    m_out = jax.random.normal(k2, (B, D_o, T, H, W), dtype=jnp.float32)
    q_in = jax.random.normal(k3, (B, D_e, H, W), dtype=jnp.float32)
    const = jnp.zeros((1,), dtype=jnp.float32)   # nn.Parameter(torch.zeros(1))

    # learnable_constant=True, small explicit tiles -> grid (B, 2, 4).
    mem, p, p_volume = memory_forward(m_in, m_out, q_in, const,
                                      learnable_constant=True, tn=128, tl=128)
    jax.block_until_ready((mem, p))

    mem_exp, p_exp, _ = _reference_forward(m_in, m_out, q_in, const, True)
    assert mem.shape == (B, D_o, H, W)
    assert p.shape == (B, T * H * W, H * W)
    assert p_volume is None
    assert jnp.allclose(p, p_exp, atol=2e-5, rtol=2e-5), "p mismatch"
    assert jnp.allclose(mem, mem_exp, atol=2e-4, rtol=2e-4), "mem mismatch"

    # learnable_constant=False with auto tile sizes (single N chunk path).
    mem2, p2, _ = memory_forward(m_in, m_out, q_in, const,
                                 learnable_constant=False)
    jax.block_until_ready((mem2, p2))
    mem2_exp, p2_exp, _ = _reference_forward(m_in, m_out, q_in, const, False)
    assert jnp.allclose(p2, p2_exp, atol=2e-5, rtol=2e-5), "p mismatch (no const)"
    assert jnp.allclose(mem2, mem2_exp, atol=2e-4, rtol=2e-4), "mem mismatch (no const)"

    print("KERNEL_OK")
</pallas_src>

<mosaic_0001>
module attributes {stable_mosaic.version = 11 : i64} {
  func.func @kernel(%arg0: i32, %arg1: i32, %arg2: i32, %arg3: memref<1xf32, #tpu.memory_space<smem>>, %arg4: memref<1x128x16xf32, #tpu.memory_space<vmem>>, %arg5: memref<1x16x128xf32, #tpu.memory_space<vmem>>, %arg6: memref<1x32x128xf32, #tpu.memory_space<vmem>>, %arg7: memref<1x32x128xf32, #tpu.memory_space<vmem>>, %arg8: memref<1x4x128x128xf32, #tpu.memory_space<vmem>>, %arg9: memref<1x128xf32, #tpu.memory_space<vmem>>, %arg10: memref<1x128xf32, #tpu.memory_space<vmem>>, %arg11: memref<32x128xf32, #tpu.memory_space<vmem>>, %arg12: memref<3x1x128xf32, #tpu.memory_space<vmem>>) attributes {dimension_semantics = [#tpu.dimension_semantics<parallel>, #tpu.dimension_semantics<parallel>, #tpu.dimension_semantics<arbitrary>], iteration_bounds = array<i64: 2, 2, 4>, scalar_prefetch = 0 : i64, scratch_operands = 4 : i64, tpu.core_type = #tpu.core_type<tc>, window_params = [{transform_indices = @transform_0, window_bounds = array<i64: 1>}, {transform_indices = @transform_1, window_bounds = array<i64: 1, 128, 16>}, {transform_indices = @transform_2, window_bounds = array<i64: 1, 16, 128>}, {transform_indices = @transform_3, window_bounds = array<i64: 1, 32, 128>}, {transform_indices = @transform_4, window_bounds = array<i64: 1, 32, 128>}, {transform_indices = @transform_5, window_bounds = array<i64: 1, 4, 128, 128>}]} {
    %c0_i32 = arith.constant 0 : i32
    %0 = arith.cmpi eq, %arg2, %c0_i32 : i32
    %1 = arith.extui %0 : i1 to i32
    %c0_i32_0 = arith.constant 0 : i32
    %2 = arith.cmpi ne, %1, %c0_i32_0 : i32
    scf.if %2 {
      %c0_27 = arith.constant 0 : index
      %47 = memref.load %arg3[%c0_27] : memref<1xf32, #tpu.memory_space<smem>>
      %cst_28 = arith.constant 0.000000e+00 : f32
      %48 = vector.broadcast %cst_28 : f32 to vector<1x128xf32>
      %49 = vector.broadcast %47 : f32 to vector<1x128xf32>
      %50 = arith.addf %48, %49 : vector<1x128xf32>
      %c0_29 = arith.constant 0 : index
      %c0_30 = arith.constant 0 : index
      %51 = vector.load %arg9[%c0_29, %c0_30] : memref<1x128xf32, #tpu.memory_space<vmem>>, vector<1x128xf32>
      tpu.vector_store %arg9[%c0_29, %c0_30], %50 {strides = array<i32>} : memref<1x128xf32, #tpu.memory_space<vmem>>, vector<1x128xf32>,
      %cst_31 = arith.constant 1.000000e+00 : f32
      %52 = vector.broadcast %cst_31 : f32 to vector<1x128xf32>
      %c0_32 = arith.constant 0 : index
      %c0_33 = arith.constant 0 : index
      %53 = vector.load %arg10[%c0_32, %c0_33] : memref<1x128xf32, #tpu.memory_space<vmem>>, vector<1x128xf32>
      tpu.vector_store %arg10[%c0_32, %c0_33], %52 {strides = array<i32>} : memref<1x128xf32, #tpu.memory_space<vmem>>, vector<1x128xf32>,
      %cst_34 = arith.constant 0.000000e+00 : f32
      %54 = vector.broadcast %cst_34 : f32 to vector<32x128xf32>
      %c0_35 = arith.constant 0 : index
      %c0_36 = arith.constant 0 : index
      %55 = vector.load %arg11[%c0_35, %c0_36] : memref<32x128xf32, #tpu.memory_space<vmem>>, vector<32x128xf32>
      tpu.vector_store %arg11[%c0_35, %c0_36], %54 {strides = array<i32>} : memref<32x128xf32, #tpu.memory_space<vmem>>, vector<32x128xf32>,
    } else {
    }
    %c0 = arith.constant 0 : index
    %c0_1 = arith.constant 0 : index
    %c0_2 = arith.constant 0 : index
    %3 = vector.load %arg4[%c0, %c0_1, %c0_2] : memref<1x128x16xf32, #tpu.memory_space<vmem>>, vector<1x128x16xf32>
    %4 = vector.shape_cast %3 : vector<1x128x16xf32> to vector<128x16xf32>
    %c0_3 = arith.constant 0 : index
    %c0_4 = arith.constant 0 : index
    %c0_5 = arith.constant 0 : index
    %5 = vector.load %arg5[%c0_3, %c0_4, %c0_5] : memref<1x16x128xf32, #tpu.memory_space<vmem>>, vector<1x16x128xf32>
    %6 = vector.shape_cast %5 : vector<1x16x128xf32> to vector<16x128xf32>
    %c0_6 = arith.constant 0 : index
    %c0_7 = arith.constant 0 : index
    %c0_8 = arith.constant 0 : index
    %7 = vector.load %arg6[%c0_6, %c0_7, %c0_8] : memref<1x32x128xf32, #tpu.memory_space<vmem>>, vector<1x32x128xf32>
    %8 = vector.shape_cast %7 : vector<1x32x128xf32> to vector<32x128xf32>
    %cst = arith.constant dense<0.000000e+00> : vector<128x128xf32>
    %9 = tpu.matmul %4, %6, %cst {dimension_numbers = #tpu.dot_dimension_numbers<[1], [0], [0], [1], [0, 0, 1, 1], [], []>} : vector<128x16xf32>, vector<16x128xf32>, vector<128x128xf32> -> vector<128x128xf32>
    %cst_9 = arith.constant 2.500000e-01 : f32
    %10 = vector.broadcast %cst_9 : f32 to vector<128x128xf32>
    %11 = arith.mulf %9, %10 : vector<128x128xf32>
    %12 = tpu.iota {dimensions = array<i32: 0>} : vector<128x128xi32>
    %c128_i32 = arith.constant 128 : i32
    %13 = arith.muli %arg2, %c128_i32 : i32
    %14 = vector.broadcast %13 : i32 to vector<128x128xi32>
    %15 = arith.addi %12, %14 : vector<128x128xi32>
    %c432_i32 = arith.constant 432 : i32
    %16 = vector.broadcast %c432_i32 : i32 to vector<128x128xi32>
    %17 = arith.cmpi slt, %15, %16 : vector<128x128xi32>
    %cst_10 = arith.constant 0xFF800000 : f32
    %18 = vector.broadcast %cst_10 : f32 to vector<128x128xf32>
    %19 = arith.select %17, %11, %18 : vector<128x128xi1>, vector<128x128xf32>
    %c0_11 = arith.constant 0 : index
    %c0_12 = arith.constant 0 : index
    %20 = vector.load %arg9[%c0_11, %c0_12] : memref<1x128xf32, #tpu.memory_space<vmem>>, vector<1x128xf32>
    %cst_13 = arith.constant dense<0xFF800000> : vector<128xf32>
    %21 = vector.multi_reduction <maximumf>, %19, %cst_13 [0] : vector<128x128xf32> to vector<128xf32>
    %22 = vector.shape_cast %21 : vector<128xf32> to vector<1x128xf32>
    %23 = arith.maximumf %20, %22 : vector<1x128xf32>
    %24 = arith.subf %20, %23 : vector<1x128xf32>
    %25 = math.exp %24 : vector<1x128xf32>
    %26 = vector.broadcast %23 : vector<1x128xf32> to vector<128x128xf32>
    %27 = arith.subf %19, %26 : vector<128x128xf32>
    %28 = math.exp %27 : vector<128x128xf32>
    %c0_14 = arith.constant 0 : index
    %c0_15 = arith.constant 0 : index
    %29 = vector.load %arg10[%c0_14, %c0_15] : memref<1x128xf32, #tpu.memory_space<vmem>>, vector<1x128xf32>
    %30 = arith.mulf %29, %25 : vector<1x128xf32>
    %cst_16 = arith.constant dense<0.000000e+00> : vector<128xf32>
    %31 = vector.multi_reduction <add>, %28, %cst_16 [0] : vector<128x128xf32> to vector<128xf32>
    %32 = vector.shape_cast %31 : vector<128xf32> to vector<1x128xf32>
    %33 = arith.addf %30, %32 : vector<1x128xf32>
    %c0_17 = arith.constant 0 : index
    %c0_18 = arith.constant 0 : index
    %34 = vector.load %arg10[%c0_17, %c0_18] : memref<1x128xf32, #tpu.memory_space<vmem>>, vector<1x128xf32>
    tpu.vector_store %arg10[%c0_17, %c0_18], %33 {strides = array<i32>} : memref<1x128xf32, #tpu.memory_space<vmem>>, vector<1x128xf32>,
    %c0_19 = arith.constant 0 : index
    %c0_20 = arith.constant 0 : index
    %35 = vector.load %arg11[%c0_19, %c0_20] : memref<32x128xf32, #tpu.memory_space<vmem>>, vector<32x128xf32>
    %36 = vector.broadcast %25 : vector<1x128xf32> to vector<32x128xf32>
    %37 = arith.mulf %35, %36 : vector<32x128xf32>
    %cst_21 = arith.constant dense<0.000000e+00> : vector<32x128xf32>
    %38 = tpu.matmul %8, %28, %cst_21 {dimension_numbers = #tpu.dot_dimension_numbers<[1], [0], [0], [1], [0, 0, 1, 1], [], []>} : vector<32x128xf32>, vector<128x128xf32>, vector<32x128xf32> -> vector<32x128xf32>
    %39 = arith.addf %37, %38 : vector<32x128xf32>
    %c0_22 = arith.constant 0 : index
    %c0_23 = arith.constant 0 : index
    %40 = vector.load %arg11[%c0_22, %c0_23] : memref<32x128xf32, #tpu.memory_space<vmem>>, vector<32x128xf32>
    tpu.vector_store %arg11[%c0_22, %c0_23], %39 {strides = array<i32>} : memref<32x128xf32, #tpu.memory_space<vmem>>, vector<32x128xf32>,
    %c3_i32 = arith.constant 3 : i32
    %41 = arith.cmpi slt, %arg2, %c3_i32 : i32
    %42 = arith.extui %41 : i1 to i32
    %c0_i32_24 = arith.constant 0 : i32
    %43 = arith.cmpi ne, %42, %c0_i32_24 : i32
    scf.if %43 {
      %c0_27 = arith.constant 0 : index
      %c0_28 = arith.constant 0 : index
      %47 = vector.load %arg9[%c0_27, %c0_28] : memref<1x128xf32, #tpu.memory_space<vmem>>, vector<1x128xf32>
      tpu.vector_store %arg9[%c0_27, %c0_28], %23 {strides = array<i32>} : memref<1x128xf32, #tpu.memory_space<vmem>>, vector<1x128xf32>,
      %48 = arith.index_cast %arg2 : i32 to index
      %c0_29 = arith.constant 0 : index
      %c0_30 = arith.constant 0 : index
      %49 = vector.load %arg12[%48, %c0_29, %c0_30] : memref<3x1x128xf32, #tpu.memory_space<vmem>>, vector<1x1x128xf32>
      %50 = vector.shape_cast %49 : vector<1x1x128xf32> to vector<1x128xf32>
      %51 = vector.shape_cast %23 : vector<1x128xf32> to vector<1x1x128xf32>
      tpu.vector_store %arg12[%48, %c0_29, %c0_30], %51 {strides = array<i32>} : memref<3x1x128xf32, #tpu.memory_space<vmem>>, vector<1x1x128xf32>,
      %c0_31 = arith.constant 0 : index
      %52 = arith.index_cast %arg2 : i32 to index
      %c0_32 = arith.constant 0 : index
      %c0_33 = arith.constant 0 : index
      %53 = vector.load %arg8[%c0_31, %52, %c0_32, %c0_33] : memref<1x4x128x128xf32, #tpu.memory_space<vmem>>, vector<1x1x128x128xf32>
      %54 = vector.shape_cast %53 : vector<1x1x128x128xf32> to vector<128x128xf32>
      %55 = vector.shape_cast %28 : vector<128x128xf32> to vector<1x1x128x128xf32>
      tpu.vector_store %arg8[%c0_31, %52, %c0_32, %c0_33], %55 {strides = array<i32>} : memref<1x4x128x128xf32, #tpu.memory_space<vmem>>, vector<1x1x128x128xf32>,
    } else {
    }
    %c3_i32_25 = arith.constant 3 : i32
    %44 = arith.cmpi eq, %arg2, %c3_i32_25 : i32
    %45 = arith.extui %44 : i1 to i32
    %c0_i32_26 = arith.constant 0 : i32
    %46 = arith.cmpi ne, %45, %c0_i32_26 : i32
    scf.if %46 {
      %c0_27 = arith.constant 0 : index
      %c0_28 = arith.constant 0 : index
      %47 = vector.load %arg10[%c0_27, %c0_28] : memref<1x128xf32, #tpu.memory_space<vmem>>, vector<1x128xf32>
      %48 = tpu.reciprocal %47 {approx = true} : vector<1x128xf32> -> vector<1x128xf32>
      %49 = arith.mulf %47, %48 : vector<1x128xf32>
      %cst_29 = arith.constant 2.000000e+00 : f32
      %50 = vector.broadcast %cst_29 : f32 to vector<1x128xf32>
      %51 = arith.subf %50, %49 : vector<1x128xf32>
      %52 = arith.mulf %48, %51 : vector<1x128xf32>
      %c0_30 = arith.constant 0 : index
      %c0_31 = arith.constant 0 : index
      %53 = vector.load %arg11[%c0_30, %c0_31] : memref<32x128xf32, #tpu.memory_space<vmem>>, vector<32x128xf32>
      %54 = vector.broadcast %52 : vector<1x128xf32> to vector<32x128xf32>
      %55 = arith.mulf %53, %54 : vector<32x128xf32>
      %c0_32 = arith.constant 0 : index
      %c0_33 = arith.constant 0 : index
      %c0_34 = arith.constant 0 : index
      %56 = vector.load %arg7[%c0_32, %c0_33, %c0_34] : memref<1x32x128xf32, #tpu.memory_space<vmem>>, vector<1x32x128xf32>
      %57 = vector.shape_cast %56 : vector<1x32x128xf32> to vector<32x128xf32>
      %58 = vector.shape_cast %55 : vector<32x128xf32> to vector<1x32x128xf32>
      tpu.vector_store %arg7[%c0_32, %c0_33, %c0_34], %58 {strides = array<i32>} : memref<1x32x128xf32, #tpu.memory_space<vmem>>, vector<1x32x128xf32>,
      %59 = vector.broadcast %52 : vector<1x128xf32> to vector<128x128xf32>
      %60 = arith.mulf %28, %59 : vector<128x128xf32>
      %c0_35 = arith.constant 0 : index
      %c3 = arith.constant 3 : index
      %c0_36 = arith.constant 0 : index
      %c0_37 = arith.constant 0 : index
      %61 = vector.load %arg8[%c0_35, %c3, %c0_36, %c0_37] : memref<1x4x128x128xf32, #tpu.memory_space<vmem>>, vector<1x1x128x128xf32>
      %62 = vector.shape_cast %61 : vector<1x1x128x128xf32> to vector<128x128xf32>
      %63 = vector.shape_cast %60 : vector<128x128xf32> to vector<1x1x128x128xf32>
      tpu.vector_store %arg8[%c0_35, %c3, %c0_36, %c0_37], %63 {strides = array<i32>} : memref<1x4x128x128xf32, #tpu.memory_space<vmem>>, vector<1x1x128x128xf32>,
      %c0_38 = arith.constant 0 : index
      %c0_39 = arith.constant 0 : index
      %c0_40 = arith.constant 0 : index
      %64 = vector.load %arg12[%c0_38, %c0_39, %c0_40] : memref<3x1x128xf32, #tpu.memory_space<vmem>>, vector<1x1x128xf32>
      %65 = vector.shape_cast %64 : vector<1x1x128xf32> to vector<1x128xf32>
      %66 = arith.subf %65, %23 : vector<1x128xf32>
      %67 = math.exp %66 : vector<1x128xf32>
      %68 = arith.mulf %67, %52 : vector<1x128xf32>
      %c0_41 = arith.constant 0 : index
      %c0_42 = arith.constant 0 : index
      %c0_43 = arith.constant 0 : index
      %c0_44 = arith.constant 0 : index
      %69 = vector.load %arg8[%c0_41, %c0_42, %c0_43, %c0_44] : memref<1x4x128x128xf32, #tpu.memory_space<vmem>>, vector<1x1x128x128xf32>
      %70 = vector.shape_cast %69 : vector<1x1x128x128xf32> to vector<128x128xf32>
      %71 = vector.broadcast %68 : vector<1x128xf32> to vector<128x128xf32>
      %72 = arith.mulf %70, %71 : vector<128x128xf32>
      %c0_45 = arith.constant 0 : index
      %c0_46 = arith.constant 0 : index
      %c0_47 = arith.constant 0 : index
      %c0_48 = arith.constant 0 : index
      %73 = vector.load %arg8[%c0_45, %c0_46, %c0_47, %c0_48] : memref<1x4x128x128xf32, #tpu.memory_space<vmem>>, vector<1x1x128x128xf32>
      %74 = vector.shape_cast %73 : vector<1x1x128x128xf32> to vector<128x128xf32>
      %75 = vector.shape_cast %72 : vector<128x128xf32> to vector<1x1x128x128xf32>
      tpu.vector_store %arg8[%c0_45, %c0_46, %c0_47, %c0_48], %75 {strides = array<i32>} : memref<1x4x128x128xf32, #tpu.memory_space<vmem>>, vector<1x1x128x128xf32>,
      %c1 = arith.constant 1 : index
      %c0_49 = arith.constant 0 : index
      %c0_50 = arith.constant 0 : index
      %76 = vector.load %arg12[%c1, %c0_49, %c0_50] : memref<3x1x128xf32, #tpu.memory_space<vmem>>, vector<1x1x128xf32>
      %77 = vector.shape_cast %76 : vector<1x1x128xf32> to vector<1x128xf32>
      %78 = arith.subf %77, %23 : vector<1x128xf32>
      %79 = math.exp %78 : vector<1x128xf32>
      %80 = arith.mulf %79, %52 : vector<1x128xf32>
      %c0_51 = arith.constant 0 : index
      %c1_52 = arith.constant 1 : index
      %c0_53 = arith.constant 0 : index
      %c0_54 = arith.constant 0 : index
      %81 = vector.load %arg8[%c0_51, %c1_52, %c0_53, %c0_54] : memref<1x4x128x128xf32, #tpu.memory_space<vmem>>, vector<1x1x128x128xf32>
      %82 = vector.shape_cast %81 : vector<1x1x128x128xf32> to vector<128x128xf32>
      %83 = vector.broadcast %80 : vector<1x128xf32> to vector<128x128xf32>
      %84 = arith.mulf %82, %83 : vector<128x128xf32>
      %c0_55 = arith.constant 0 : index
      %c1_56 = arith.constant 1 : index
      %c0_57 = arith.constant 0 : index
      %c0_58 = arith.constant 0 : index
      %85 = vector.load %arg8[%c0_55, %c1_56, %c0_57, %c0_58] : memref<1x4x128x128xf32, #tpu.memory_space<vmem>>, vector<1x1x128x128xf32>
      %86 = vector.shape_cast %85 : vector<1x1x128x128xf32> to vector<128x128xf32>
      %87 = vector.shape_cast %84 : vector<128x128xf32> to vector<1x1x128x128xf32>
      tpu.vector_store %arg8[%c0_55, %c1_56, %c0_57, %c0_58], %87 {strides = array<i32>} : memref<1x4x128x128xf32, #tpu.memory_space<vmem>>, vector<1x1x128x128xf32>,
      %c2 = arith.constant 2 : index
      %c0_59 = arith.constant 0 : index
      %c0_60 = arith.constant 0 : index
      %88 = vector.load %arg12[%c2, %c0_59, %c0_60] : memref<3x1x128xf32, #tpu.memory_space<vmem>>, vector<1x1x128xf32>
      %89 = vector.shape_cast %88 : vector<1x1x128xf32> to vector<1x128xf32>
      %90 = arith.subf %89, %23 : vector<1x128xf32>
      %91 = math.exp %90 : vector<1x128xf32>
      %92 = arith.mulf %91, %52 : vector<1x128xf32>
      %c0_61 = arith.constant 0 : index
      %c2_62 = arith.constant 2 : index
      %c0_63 = arith.constant 0 : index
      %c0_64 = arith.constant 0 : index
      %93 = vector.load %arg8[%c0_61, %c2_62, %c0_63, %c0_64] : memref<1x4x128x128xf32, #tpu.memory_space<vmem>>, vector<1x1x128x128xf32>
      %94 = vector.shape_cast %93 : vector<1x1x128x128xf32> to vector<128x128xf32>
      %95 = vector.broadcast %92 : vector<1x128xf32> to vector<128x128xf32>
      %96 = arith.mulf %94, %95 : vector<128x128xf32>
      %c0_65 = arith.constant 0 : index
      %c2_66 = arith.constant 2 : index
      %c0_67 = arith.constant 0 : index
      %c0_68 = arith.constant 0 : index
      %97 = vector.load %arg8[%c0_65, %c2_66, %c0_67, %c0_68] : memref<1x4x128x128xf32, #tpu.memory_space<vmem>>, vector<1x1x128x128xf32>
      %98 = vector.shape_cast %97 : vector<1x1x128x128xf32> to vector<128x128xf32>
      %99 = vector.shape_cast %96 : vector<128x128xf32> to vector<1x1x128x128xf32>
      tpu.vector_store %arg8[%c0_65, %c2_66, %c0_67, %c0_68], %99 {strides = array<i32>} : memref<1x4x128x128xf32, #tpu.memory_space<vmem>>, vector<1x1x128x128xf32>,
    } else {
    }
    return
  }
  func.func @transform_0(%arg0: i32, %arg1: i32, %arg2: i32) -> i32 {
    %c0_i32 = arith.constant 0 : i32
    %c0_i32_0 = arith.constant 0 : i32
    return %c0_i32 : i32
  }
  func.func @transform_1(%arg0: i32, %arg1: i32, %arg2: i32) -> (i32, i32, i32) {
    %c0_i32 = arith.constant 0 : i32
    %c0_i32_0 = arith.constant 0 : i32
    return %arg0, %arg2, %c0_i32 : i32, i32, i32
  }
  func.func @transform_2(%arg0: i32, %arg1: i32, %arg2: i32) -> (i32, i32, i32) {
    %c0_i32 = arith.constant 0 : i32
    %c0_i32_0 = arith.constant 0 : i32
    return %arg0, %c0_i32, %arg1 : i32, i32, i32
  }
  func.func @transform_3(%arg0: i32, %arg1: i32, %arg2: i32) -> (i32, i32, i32) {
    %c0_i32 = arith.constant 0 : i32
    %c0_i32_0 = arith.constant 0 : i32
    return %arg0, %c0_i32, %arg2 : i32, i32, i32
  }
  func.func @transform_4(%arg0: i32, %arg1: i32, %arg2: i32) -> (i32, i32, i32) {
    %c0_i32 = arith.constant 0 : i32
    %c0_i32_0 = arith.constant 0 : i32
    return %arg0, %c0_i32, %arg1 : i32, i32, i32
  }
  func.func @transform_5(%arg0: i32, %arg1: i32, %arg2: i32) -> (i32, i32, i32, i32) {
    %c0_i32 = arith.constant 0 : i32
    %c0_i32_0 = arith.constant 0 : i32
    %c0_i32_1 = arith.constant 0 : i32
    return %arg0, %c0_i32, %c0_i32_0, %arg1 : i32, i32, i32, i32
  }
}

</mosaic_0001>

<bundles_post_ra>
// kernel: tpu_custom_call.1
= control target key start
LH: loop header
LB: loop body
LE: loop exit
PB: predicated region body
PF: predicated region fallthrough
CT: control target
= control target key end

     0   :  { %s2358_s0 = inlined_call_operand.<no memory space> [shape: f32[1], index: 0, kind: input, shape index: {}]   ;;  %s2359_s1 = inlined_call_operand.vmem [shape: f32[2,512,16], index: 1, kind: input, shape index: {}]   ;;  %s2360_s2 = inlined_call_operand.vmem [shape: f32[2,16,256], index: 2, kind: input, shape index: {}]   ;;  %s2361_s3 = inlined_call_operand.vmem [shape: f32[2,32,512], index: 3, kind: input, shape index: {}]   ;;  %s2362_s4 = inlined_call_operand.hbm [shape: f32[2,32,256], index: 4, kind: output, shape index: {0}]   ;;  %s2363_s5 = inlined_call_operand.hbm [shape: f32[2,4,128,256], index: 5, kind: output, shape index: {1}]  }
   0x1   :  { %2372 = sst [smem:[#allocation23_spill]] %s2360_s2 }
   0x2   :  { %2373 = sst [smem:[#allocation24_spill]] %s2361_s3 }
   0x3   :  { %11 = sst [smem:[#allocation6]] %s2358_s0 }
   0x4   :  { %12 = vsyncpa [#allocation10], 0 }
   0x5   :  { %14 = vsyncpa [#allocation10 + $0x1], 0 }
   0x6   :  { %15 = vsyncpa [#allocation12], 0 }
   0x7   :  { %17 = vsyncpa [#allocation12 + $0x1], 0  ;;  %s1747_s20 = smov 0   ;;  %s1749_s21 = smov 0  }
   0x8   :  { %s1751_s22 = smov 0   ;;  %s1753_s23 = smov 0  }
   0x9   :  { %s1755_s24 = smov 0   ;;  %s1757_s25 = smov 0  }
   0xa   :  { %s1759_s26 = smov 0   ;;  %s1761_s27 = smov 0  }
   0xb   :  { %s1763_s0 = smov 0   ;;  %s1765_s28 = smov 0  }
   0xc   :  { %s1767_s29 = smov 0   ;;  %s1769_s30 = smov 0  }
   0xd LB: > { %2374 = sst [smem:[#allocation15_spill]] %s1663_s20  ;;  %s1248_s6 = sadd.s32 4294967295, %s1707_s30   ;;  %s1707_s30 = sphi %s1769_s30, %s23_s30   ;;  %s1703_s29 = sphi %s1767_s29, %s2395_s29   ;;  %s1699_s28 = sphi %s1765_s28, %s2394_s28   ;;  %s1695_s0 = sphi %s1763_s0, %s2393_s0   ;;  %s1691_s27 = sphi %s1761_s27, %s2392_s27   ;;  %s1687_s26 = sphi %s1759_s26, %s2391_s26   ;;  %s1683_s25 = sphi %s1757_s25, %s2390_s25   ;;  %s1679_s24 = sphi %s1755_s24, %s2400_s24   ;;  %s1675_s23 = sphi %s1753_s23, %s2399_s23   ;;  %s1671_s22 = sphi %s1751_s22, %s2398_s22   ;;  %s1667_s21 = sphi %s1749_s21, %s2397_s21   ;;  %s1663_s20 = sphi %s1747_s20, %s2396_s20  }
   0xe   : > { %2375 = sst [smem:[#allocation16_spill]] %s1695_s0  ;;  %s1249_s7 = sadd.s32 4294967294, %s1707_s30  }
   0xf   : > { %2376 = sst [smem:[#allocation17_spill]] %s1699_s28  ;;  %s35_s8 = sadd.s32 1, %s1695_s0 }
  0x10   : > { %2377 = sst [smem:[#allocation18_spill]] %s1703_s29  ;;  %p36_p0 = scmp.ge.s32.totalorder %s35_s8, 4 }
  0x11   : > { %s38_s9 = sadd.s32 1, %s1699_s28  ;;  %s42_s10 = sadd.s32 1, %s1703_s29 }
  0x12   : > { %p107_p1 = scmp.ne.s32.totalorder %s1679_s24, %s1675_s23  ;;  %s2402_s8 = smov (%p36_p0, %s35_s8), 0 }
  0x13   : > { %2378 = sst [smem:[#allocation19_spill]] %s2402_s8  ;;  %s2404_s9 = smov (!%p36_p0, %s38_s9), %s1699_s28 }
  0x14   : > { %s100_s11 = sadd.s32 1, %s1679_s24  ;;  %p108_p2 = scmp.eq.s32.totalorder %s1707_s30, 0 }
  0x15   : > { %p40_p3 = scmp.ge.s32.totalorder %s2404_s9, 2  ;;  %s124_s12 = ssub.s32 %s1695_s0, %s2402_s8 }
  0x16   : > { %p1824_p4 = por %p108_p2, %p107_p1  ;;  %p135_p5 = scmp.ne.s32.totalorder %s1671_s22, %s1667_s21 }
  0x17   : > { %s2406_s9 = smov (%p40_p3, %s2404_s9), 0  ;;  %s2408_s10 = smov (!%p40_p3, %s42_s10), %s1703_s29 }
  0x18   : > { %2380 = sst [smem:[#allocation20_spill]] %s2406_s9  ;;  %s96_s14 = ssub.s32 %s1699_s28, %s2406_s9 }
  0x19   : > { %p1835_p6 = por %p135_p5, %p108_p2  ;;  %p44_p7 = scmp.ge.s32.totalorder %s2408_s10, 2 }
  0x1a   : > { %p167_p8 = scmp.eq.s32.totalorder %s1248_s6, 15  ;;  %p172_p9 = scmp.ne.s32.totalorder %s1675_s23, %s1663_s20 }
  0x1b   : > { %p173_p10 = scmp.eq.s32.totalorder %s1249_s7, 15  ;;  %s2410_s10 = smov (%p44_p7, %s2408_s10), 0 }
  0x1c   : > { %2382 = sst [smem:[#allocation21_spill]] %s2410_s10  ;;  %p1846_p11 = por %p167_p8, %p107_p1 }
  0x1d   : > { %p1850_p12 = por %p173_p10, %p172_p9  ;;  %s95_s18 = ssub.s32 %s1703_s29, %s2410_s10 }
  0x1e   : > { %s128_s19 = sadd.s32 1, %s1671_s22  ;;  %s97_s9 = sor.u32 %s96_s14, %s95_s18 }
  0x1f   : > { %s2384_s17 = scalar_select %p1850_p12, 1, 0 }
  0x20   : > { %s125_s8 = sor.u32 %s124_s12, %s95_s18  ;;  %p98_p13 = scmp.eq.s32.totalorder %s97_s9, 0 }
  0x21   : > { %2385 = sst [smem:[#allocation22_spill]] %s2384_s17  ;;  %p126_p0 = scmp.eq.s32.totalorder %s125_s8, 0 }
  0x22   : > { %s1858_s6 = scalar_select %p98_p13, %s1679_s24, %s100_s11  }
  0x23   : > { %s1861_s7 = scalar_select %p126_p0, %s1671_s22, %s128_s19  }
  0x24   : > { %p1251_p2 = scmp.ge.s32.totalorder %s1707_s30, 16 }
  0x26   : > { %220 = sbr.rel (%p1251_p2) target bundleno = 69 (0x45), region = 20 }
  0x2b   : > { %236 = sbr.rel (!%p1824_p4) target bundleno = 55 (0x37), region = 28  ;;  %s238_s17 = sand.u32 (%p1824_p4), 1, %s1679_s24  }
  0x2c   : > { %s1253_s10 = sshll.u32 (%p1824_p4), %s1703_s29, 2  ;;  %s1252_s20 = sshll.u32 (%p1824_p4), %s238_s17, 4 }
  0x2d   : > { %s242_s14 = sadd.s32 (%p1824_p4), %s1699_s28, %s1253_s10  ;;  %s2386_s2 = sld [smem:[#allocation23_spill]] (%p1824_p4) }
  0x2e   : > { %s1254_s12 = sshll.u32 (%p1824_p4), %s242_s14, 3  ;;  %s240_s18 = scalar_lea.vmem (%p1824_p4), [#allocation7], %s1252_s20 }
  0x33   : > { %s244_s11 = scalar_lea.vmem %s2386_s2, %s1254_s12 }
  0x34   : > { %v275_v0 = vld [vmem:[%s244_s11] sm:$0xff]  ;;  %v277_v1 = vld [vmem:[%s244_s11 + $0x10] sm:$0xff] }
  0x35   : > { %276 = vst [vmem:[%s240_s18] sm:$0xff] %v275_v0 }
  0x36   : > { %278 = vst [vmem:[%s240_s18 + $0x8] sm:$0xff] %v277_v1 }
  0x37 PF: > { %284 = sbr.rel (!%p1835_p6) target bundleno = 69 (0x45), region = 66  ;;  %s286_s13 = sand.u32 (%p1835_p6), 1, %s1671_s22  }
  0x38   : > { %s1256_s17 = sshll.u32 (%p1835_p6), %s1703_s29, 4  ;;  %s1255_s10 = sshll.u32 (%p1835_p6), %s286_s13, 5 }
  0x39   : > { %s290_s19 = sadd.s32 (%p1835_p6), %s1695_s0, %s1256_s17  ;;  %s2387_s3 = sld [smem:[#allocation24_spill]] (%p1835_p6) }
  0x3a   : > { %s1257_s14 = sshll.u32 (%p1835_p6), %s290_s19, 3  ;;  %s288_s20 = scalar_lea.vmem (%p1835_p6), [#allocation8], %s1255_s10 }
  0x3f   : > { %s292_s12 = scalar_lea.vmem %s2387_s3, %s1257_s14 }
  0x40   : > { %v327_v2 = vld [vmem:[%s292_s12] sm:$0xff] }
  0x41   : > { %v329_v3 = vld [vmem:[%s292_s12 + $0x20] sm:$0xff]  ;;  %328 = vst [vmem:[%s288_s20] sm:$0xff] %v327_v2 }
  0x42   : > { %v331_v4 = vld [vmem:[%s292_s12 + $0x40] sm:$0xff]  ;;  %330 = vst [vmem:[%s288_s20 + $0x8] sm:$0xff] %v329_v3 }
  0x43   : > { %v333_v5 = vld [vmem:[%s292_s12 + $0x60] sm:$0xff]  ;;  %332 = vst [vmem:[%s288_s20 + $0x10] sm:$0xff] %v331_v4 }
  0x44   : > { %334 = vst [vmem:[%s288_s20 + $0x18] sm:$0xff] %v333_v5 }
  0x45 PF: > { %p1258_p1 = scmp.ge.s32.totalorder %s1707_s30, 1  ;;  %p339_p3 = scmp.lt.s32.totalorder %s1707_s30, 17 }
  0x47   : > { %p340_p4 = pnand %p1258_p1, %p339_p3 }
  0x48   : > { %s1883_s28 = sand.u32 (!%p340_p4), 1, %s1675_s23   ;;  %s353_s15 = sand.u32 (!%p340_p4), 1, %s1667_s21  }
  0x49   : > { %343 = sbr.rel (%p340_p4) target bundleno = 631 (0x277), region = 104  ;;  %s1259_s8 = sshll.u32 (!%p340_p4), %s1883_s28, 4 }
  0x4a   : > { %s1260_s11 = sshll.u32 (!%p340_p4), %s353_s15, 5  ;;  %s1261_s18 = sshll.u32 (!%p340_p4), %s1883_s28, 5 }
  0x4b   : > { %s1262_s13 = sshll.u32 (!%p340_p4), %s1883_s28, 9  ;;  %s1263_s17 = sshll.u32 (!%p340_p4), %s1683_s25, 4 }
  0x4c   : > { %p399_p5 = scmp.lt.s32.totalorder (!%p340_p4), %s1691_s27, 1  ;;  %p401_p6 = scmp.lt.s32.totalorder (!%p340_p4), %s1263_s17, 63 }
  0x4d   : > { %s348_s3 = scalar_lea.vmem (!%p340_p4), [#allocation7], %s1259_s8  ;;  %s1897_s29 = scalar_lea.vmem (!%p340_p4), [#allocation8], %s1260_s11 }
  0x4e   : > { %s400_s10 = scalar_select %p399_p5, %s1691_s27, 1 }
  0x4f   : > { %s2412_s17 = smov (!%p401_p6, %s1263_s17), 63  ;;  %s1899_s21 = scalar_lea.vmem [#allocation9], %s1261_s18 }
  0x50   : > { %s1264_s19 = sshll.u32 %s400_s10, 6  ;;  %s1901_s15 = scalar_lea.vmem [#allocation11], %s1262_s13 }
  0x51   : > { %s404_s14 = sadd.s32 %s1264_s19, %s2412_s17  ;;  %p1266_p7 = scmp.ne.s32.totalorder %s1683_s25, 0 }
  0x52   : > { %s1265_s9 = sshll.u32 %s404_s14, 3  ;;  %s412_s0 = sld [smem:[#allocation6]] (!%p1266_p7) }
  0x53   : > { %s1895_s2 = scalar_lea.vmem %s2359_s1, %s1265_s9  ;;  %411 = sbr.rel (%p1266_p7) target bundleno = 95 (0x5f), region = 116 }
  0x58   : > { %v1709_v6 = vmov 1.0   ;;  %v1710_v7 = vmov 0.0   ;;  %v413_v8 = vstv %s412_s0 }
  0x59   : > { %416 = vst [vmem:[#allocation3] sm:$0x1] %v1709_v6 }
  0x5a   : > { %417 = vst [vmem:[#allocation4 + $0x10] sm:$0xff] %v1710_v7 }
  0x5b   : > { %418 = vst [vmem:[#allocation4] sm:$0xff] %v1710_v7 }
  0x5c   : > { %419 = vst [vmem:[#allocation4 + $0x18] sm:$0xff] %v1710_v7 }
  0x5d   : > { %420 = vst [vmem:[#allocation4 + $0x8] sm:$0xff] %v1710_v7 }
  0x5e   : > { %415 = vst [vmem:[#allocation2] sm:$0x1] %v413_v8 }
  0x5f PF: > { %v438_v9 = vld [vmem:[%s348_s3 + $0x8] sm:$0xff]  ;;  %v437_v10 = vld [vmem:[%s348_s3] sm:$0xff]  ;;  %vm443_vm0 = vcmask 130048   ;;  %v573_v33 = vlaneseq  ;;  %p1284_p8 = scmp.ge.s32.totalorder %s1683_s25, 3 }
  0x60   : > { %506 = vmatpush.msra.mxu0 %v438_v9  ;;  %1374 = vmatpush.msra.mxu2 %v438_v9  ;;  %v421_v11 = vld [vmem:[%s1895_s2] sm:$0xff]  ;;  %v427_v12 = vld [vmem:[%s1895_s2 + $0x30] sm:$0xff]  ;;  %v422_v14 = vld [vmem:[%s1895_s2 + $0x8] sm:$0xff]  ;;  %s795_s0 = scalar_lea.vmem (!%p1284_p8), [#allocation5], %s1683_s25 }
  0x61   : > { %1375 = vmatpush.msra.mxu3 %v438_v9  ;;  %v433_v13 = vld [vmem:[%s1895_s2 + $0x60] sm:$0xff]  ;;  %v428_v15 = vld [vmem:[%s1895_s2 + $0x38] sm:$0xff]  ;;  %v434_v16 = vld [vmem:[%s1895_s2 + $0x68] sm:$0xff]  ;;  %v574_v34 = vshrl.u32 %v573_v33, 7 }
  0x62   : > { %507 = vmatpush.msra.mxu0 %v437_v10  ;;  %1376 = vmatpush.msra.mxu2 %v437_v10  ;;  %v423_v17 = vld [vmem:[%s1895_s2 + $0x10] sm:$0xff]  ;;  %v429_v18 = vld [vmem:[%s1895_s2 + $0x40] sm:$0xff]  ;;  %v424_v20 = vld [vmem:[%s1895_s2 + $0x18] sm:$0xff] }
  0x63   : > { %1267 = vmatmul.msk.f32.vlgmr.msra.gmra.mxu0 %vm443_vm0, %v421_v11  ;;  %1273 = vmatmul.msk.f32.vlgmr.msra.gmra.mxu2 %vm443_vm0, %v427_v12  ;;  %v435_v19 = vld [vmem:[%s1895_s2 + $0x70] sm:$0xff]  ;;  %v430_v21 = vld [vmem:[%s1895_s2 + $0x48] sm:$0xff]  ;;  %v436_v22 = vld [vmem:[%s1895_s2 + $0x78] sm:$0xff]  ;;  %v580_v38 = vadd.s32 48, %v574_v34  ;;  %v575_v39 = vadd.s32 8, %v574_v34  ;;  %v576_v41 = vadd.s32 16, %v574_v34 }
  0x64   : > { %1377 = vmatpush.msra.mxu3 %v437_v10  ;;  %v425_v23 = vld [vmem:[%s1895_s2 + $0x20] sm:$0xff]  ;;  %v431_v24 = vld [vmem:[%s1895_s2 + $0x50] sm:$0xff]  ;;  %v426_v25 = vld [vmem:[%s1895_s2 + $0x28] sm:$0xff]  ;;  %v581_v42 = vadd.s32 56, %v574_v34  ;;  %v582_v43 = vadd.s32 64, %v574_v34  ;;  %v577_v44 = vadd.s32 24, %v574_v34 }
  0x65   : > { %1279 = vmatmul.msk.f32.vlgmr.msra.gmra.mxu3 %vm443_vm0, %v433_v13  ;;  %v432_v26 = vld [vmem:[%s1895_s2 + $0x58] sm:$0xff]  ;;  %s1283_s2 = sshll.u32 %s1683_s25, 7  ;;  %v578_v45 = vadd.s32 32, %v574_v34  ;;  %v583_v51 = vadd.s32 72, %v574_v34  ;;  %v587_v52 = vadd.s32 104, %v574_v34  ;;  %v584_v56 = vadd.s32 80, %v574_v34 }
  0x66   : > { %v591_v40 = vstv %s1283_s2  ;;  %v579_v57 = vadd.s32 40, %v574_v34  ;;  %v586_v60 = vadd.s32 96, %v574_v34  ;;  %v588_v62 = vadd.s32 112, %v574_v34  ;;  %s797_s3 = scalar_lea.vmem (!%p1284_p8), %s1901_s15, %s1283_s2 [#allocation11] }
  0x67   : > { %v592_v46 = vadd.s32 %v591_v40, %v574_v34  ;;  %v598_v47 = vadd.s32 %v591_v40, %v580_v38  ;;  %v593_v48 = vadd.s32 %v591_v40, %v575_v39  ;;  %v594_v50 = vadd.s32 %v591_v40, %v576_v41 }
  0x68   : > { %v1947_v53 = vadd.s32 %v591_v40, %v581_v42  ;;  %v1949_v54 = vadd.s32 %v591_v40, %v582_v43  ;;  %v595_v59 = vadd.s32 %v591_v40, %v577_v44  ;;  %v596_v61 = vadd.s32 %v591_v40, %v578_v45 }
  0x69   : > { %vm608_vm1 = vcmp.lt.s32.totalorder %v592_v46, 432  ;;  %vm614_vm2 = vcmp.lt.s32.totalorder %v598_v47, 432  ;;  %vm609_vm3 = vcmp.lt.s32.totalorder %v593_v48, 432  ;;  %vm610_vm4 = vcmp.lt.s32.totalorder %v594_v50, 432 }
  0x6a   : > { %v601_v0 = vadd.s32 %v591_v40, %v583_v51  ;;  %v605_v1 = vadd.s32 %v591_v40, %v587_v52  ;;  %vm615_vm5 = vcmp.lt.s32.totalorder %v1947_v53, 432  ;;  %vm616_vm6 = vcmp.lt.s32.totalorder %v1949_v54, 432 }
  0x6b   : > { %1268 = vmatmul.msk.f32.gmra.mxu0 %vm443_vm0, %v422_v14  ;;  %1274 = vmatmul.msk.f32.gmra.mxu2 %vm443_vm0, %v428_v15  ;;  %v602_v3 = vadd.s32 %v591_v40, %v584_v56  ;;  %v597_v4 = vadd.s32 %v591_v40, %v579_v57  ;;  %vm611_vm7 = vcmp.lt.s32.totalorder %v595_v59, 432  ;;  %v604_v5 = vadd.s32 %v591_v40, %v586_v60 }
  0x6c   : > { %vm612_vm8 = vcmp.lt.s32.totalorder %v596_v61, 432  ;;  %v606_v9 = vadd.s32 %v591_v40, %v588_v62  ;;  %v585_v10 = vadd.s32 88, %v574_v34  ;;  %v589_v11 = vadd.s32 120, %v574_v34 }
  0x6d   : > { %1280 = vmatmul.msk.f32.gmra.mxu3 %vm443_vm0, %v434_v16  ;;  %vm617_vm9 = vcmp.lt.s32.totalorder %v601_v0, 432  ;;  %vm621_vm10 = vcmp.lt.s32.totalorder %v605_v1, 432  ;;  %vm618_vm11 = vcmp.lt.s32.totalorder %v602_v3, 432  ;;  %vm613_vm12 = vcmp.lt.s32.totalorder %v597_v4, 432  ;;  %v1998_v1 = vld [vmem:[#allocation2] sm:$0x1] }
  0x6e   : > { %vm622_vm13 = vcmp.lt.s32.totalorder %v606_v9, 432 }
  0x73   : > { %1269 = vmatmul.msk.f32.gmra.mxu0 %vm443_vm0, %v423_v17  ;;  %1275 = vmatmul.msk.f32.gmra.mxu2 %vm443_vm0, %v429_v18 }
  0x75   : > { %1281 = vmatmul.msk.f32.gmra.mxu3 %vm443_vm0, %v435_v19 }
  0x7b   : > { %1270 = vmatmul.msk.f32.gmra.mxu0 %vm443_vm0, %v424_v20  ;;  %1276 = vmatmul.msk.f32.gmra.mxu2 %vm443_vm0, %v430_v21 }
  0x7d   : > { %1282 = vmatmul.msk.f32.gmra.mxu3 %vm443_vm0, %v436_v22  ;;  %v603_v22 = vadd.s32 %v591_v40, %v585_v10 }
  0x7f   : > { %vm619_vm14 = vcmp.lt.s32.totalorder %v603_v22, 432 }
  0x83   : > { %1271 = vmatmul.msk.f32.gmra.mxu0 %vm443_vm0, %v425_v23  ;;  %1277 = vmatmul.msk.f32.gmra.mxu2 %vm443_vm0, %v431_v24  ;;  %v607_v24 = vadd.s32 %v591_v40, %v589_v11 }
  0x85   : > { %vm623_vm15 = vcmp.lt.s32.totalorder %v607_v24, 432 }
  0x8b   : > { %1272 = vmatmul.msk.f32.gmra.mxu0 %vm443_vm0, %v426_v25  ;;  %1278 = vmatmul.msk.f32.gmra.mxu2 %vm443_vm0, %v432_v26  ;;  %vm620_vm0 = vcmp.lt.s32.totalorder %v604_v5, 432 }
  0xe0   : > { %v509_v27 = vpop.f32.mrf.mxu0 }
  0xe1   : > { %v557_v63 = vmul.f32 0.25, %v509_v27 }
  0xe3   : > { %v1954_v12 = vsel %vm608_vm1, %v557_v63, -inf }
  0xe6   : > { %v527_v28 = vpop.f32.mrf.mxu2 }
  0xe7   : > { %v563_v2 = vmul.f32 0.25, %v527_v28 }
  0xe8   : > { %v512_v29 = vpop.f32.mrf.mxu0  ;;  %v1936_v30 = vpop.f32.mrf.mxu3 }
  0xe9   : > { %v558_v7 = vmul.f32 0.25, %v512_v29  ;;  %v1957_v14 = vsel %vm614_vm2, %v563_v2, -inf  ;;  %v569_v43 = vmul.f32 0.25, %v1936_v30 }
  0xeb   : > { %v1963_v21 = vsel %vm609_vm3, %v558_v7, -inf }
  0xee   : > { %v1938_v31 = vpop.f32.mrf.mxu2 }
  0xef   : > { %v564_v25 = vmul.f32 0.25, %v1938_v31 }
  0xf0   : > { %v515_v32 = vpop.f32.mrf.mxu0  ;;  %v1942_v36 = vpop.f32.mrf.mxu3 }
  0xf1   : > { %v559_v13 = vmul.f32 0.25, %v515_v32  ;;  %v570_v32 = vmul.f32 0.25, %v1942_v36  ;;  %v1989_v36 = vsel %vm615_vm5, %v564_v25, -inf }
  0xf3   : > { %v1967_v26 = vsel %vm610_vm4, %v559_v13, -inf  ;;  %v637_v48 = vsel %vm621_vm10, %v570_v32, -inf }
  0xf4   : > { %v643_v39 = vmax.f32 %v1967_v26, %v1957_v14 }
  0xf6   : > { %v1940_v35 = vpop.f32.mrf.mxu2 }
  0xf7   : > { %v565_v27 = vmul.f32 0.25, %v1940_v35 }
  0xf8   : > { %v518_v37 = vpop.f32.mrf.mxu0  ;;  %v551_v58 = vpop.f32.mrf.mxu3 }
  0xf9   : > { %v560_v15 = vmul.f32 0.25, %v518_v37  ;;  %v571_v34 = vmul.f32 0.25, %v551_v58  ;;  %v632_v42 = vsel %vm616_vm6, %v565_v27, -inf }
  0xfb   : > { %v1978_v37 = vsel %vm611_vm7, %v560_v15, -inf }
  0xfc   : > { %v644_v45 = vmax.f32 %v1978_v37, %v1989_v36 }
  0xfe   : > { %v536_v49 = vpop.f32.mrf.mxu2 }
  0xff   : > { %v566_v17 = vmul.f32 0.25, %v536_v49  ;;  %v638_v49 = vsel %vm622_vm13, %v571_v34, -inf }
 0x100   : > { %v521_v55 = vpop.f32.mrf.mxu0  ;;  %v554_v23 = vpop.f32.mrf.mxu3 }
 0x101   : > { %v561_v6 = vmul.f32 0.25, %v521_v55  ;;  %v1981_v31 = vsel %vm617_vm9, %v566_v17, -inf  ;;  %v572_v35 = vmul.f32 0.25, %v554_v23  ;;  %v636_v55 = vsel %vm620_vm0, %v569_v43, -inf }
 0x103   : > { %v1960_v18 = vsel %vm612_vm8, %v561_v6, -inf  ;;  %v639_v51 = vsel %vm623_vm15, %v572_v35, -inf }
 0x104   : > { %v641_v29 = vmax.f32 %v1954_v12, %v1960_v18 }
 0x106   : > { %v539_v8 = vpop.f32.mrf.mxu2  ;;  %v645_v46 = vmax.f32 %v641_v29, %v632_v42 }
 0x107   : > { %v567_v19 = vmul.f32 0.25, %v539_v8 }
 0x108   : > { %v524_v16 = vpop.f32.mrf.mxu0  ;;  %v649_v54 = vmax.f32 %v645_v46, %v636_v55 }
 0x109   : > { %v562_v20 = vmul.f32 0.25, %v524_v16  ;;  %v634_v38 = vsel %vm618_vm11, %v567_v19, -inf }
 0x10a   : > { %v647_v47 = vmax.f32 %v643_v39, %v634_v38 }
 0x10b   : > { %v1970_v28 = vsel %vm613_vm12, %v562_v20, -inf }
 0x10c   : > { %v642_v33 = vmax.f32 %v1963_v21, %v1970_v28  ;;  %v651_v56 = vmax.f32 %v647_v47, %v638_v49 }
 0x10e   : > { %v646_v40 = vmax.f32 %v642_v33, %v1981_v31  ;;  %v542_v41 = vpop.f32.mrf.mxu2 }
 0x10f   : > { %v568_v44 = vmul.f32 0.25, %v542_v41 }
 0x110   : > { %v650_v52 = vmax.f32 %v646_v40, %v637_v48 }
 0x111   : > { %v635_v50 = vsel %vm619_vm14, %v568_v44, -inf }
 0x112   : > { %v648_v53 = vmax.f32 %v644_v45, %v635_v50  ;;  %v653_v30 = vmax.f32 %v649_v54, %v650_v52 }
 0x114   : > { %v652_v57 = vmax.f32 %v648_v53, %v639_v51 }
 0x116   : > { %v654_v58 = vmax.f32 %v651_v56, %v652_v57 }
 0x118   : > { %v655_v59 = vmax.f32 %v653_v30, %v654_v58 }
 0x11a   : > { %v656_v60 = vrot.slane %v655_v59, 4 }
 0x11c   : > { %v657_v61 = vmax.f32 %v655_v59, %v656_v60  ;;  %v439_v60 = vld [vmem:[%s1897_s29] sm:$0xff] }
 0x11e   : > { %v658_v62 = vrot.slane %v657_v61, 2 }
 0x120   : > { %v659_v63 = vmax.f32 %v657_v61, %v658_v62  ;;  %v442_v61 = vld [vmem:[%s1897_s29 + $0x18] sm:$0xff] }
 0x122   : > { %v660_v0 = vrot.slane %v659_v63, 1 }
 0x124   : > { %v661_v2 = vmax.f32 %v659_v63, %v660_v0 }
 0x126   : > { %v2001_v3 = vmax.f32 %v1998_v1, %v661_v2 }
 0x128   : > { %v667_v4 = vperm.slane %v2001_v3, 0 }
 0x12a   : > { %v684_v5 = vsub.f32 %v639_v51, %v667_v4  ;;  %v683_v6 = vsub.f32 %v638_v49, %v667_v4  ;;  %v682_v7 = vsub.f32 %v637_v48, %v667_v4  ;;  %v681_v10 = vsub.f32 %v636_v55, %v667_v4 }
 0x12b   : > { %v680_v13 = vsub.f32 %v635_v50, %v667_v4  ;;  %v679_v16 = vsub.f32 %v634_v38, %v667_v4  ;;  %v678_v19 = vsub.f32 %v1981_v31, %v667_v4  ;;  %v677_v20 = vsub.f32 %v632_v42, %v667_v4 }
 0x12c   : > { %v715_v8 = vmul.f32 1.442695, %v684_v5  ;;  %v713_v9 = vmul.f32 1.442695, %v683_v6  ;;  %v711_v11 = vmul.f32 1.442695, %v682_v7  ;;  %v670_v24 = vsub.f32 %v1963_v21, %v667_v4 }
 0x12d   : > { %v709_v15 = vmul.f32 1.442695, %v681_v10  ;;  %v707_v17 = vmul.f32 1.442695, %v680_v13  ;;  %v705_v23 = vmul.f32 1.442695, %v679_v16  ;;  %v669_v25 = vsub.f32 %v1954_v12, %v667_v4 }
 0x12e   : > { %1507 = vpow2.f32 %v715_v8  ;;  %v703_v29 = vmul.f32 1.442695, %v678_v19  ;;  %v676_v32 = vsub.f32 %v1989_v36, %v667_v4  ;;  %v701_v33 = vmul.f32 1.442695, %v677_v20  ;;  %v717_v20 = vld [vmem:[#allocation3] sm:$0x1] }
 0x12f   : > { %1509 = vpow2.f32 %v713_v9  ;;  %v671_v34 = vsub.f32 %v1967_v26, %v667_v4  ;;  %v675_v31 = vsub.f32 %v1957_v14, %v667_v4  ;;  %v687_v38 = vmul.f32 1.442695, %v670_v24 }
 0x130   : > { %1511 = vpow2.f32 %v711_v11  ;;  %v672_v12 = vsub.f32 %v1978_v37, %v667_v4  ;;  %v685_v35 = vmul.f32 1.442695, %v669_v25  ;;  %v699_v40 = vmul.f32 1.442695, %v676_v32  ;;  %v441_v11 = vld [vmem:[%s1897_s29 + $0x10] sm:$0xff] }
 0x131   : > { %1513 = vpow2.f32 %v709_v15  ;;  %v674_v41 = vsub.f32 %v1970_v28, %v667_v4  ;;  %v673_v14 = vsub.f32 %v1960_v18, %v667_v4  ;;  %v689_v26 = vmul.f32 1.442695, %v671_v34  ;;  %v440_v4 = vld [vmem:[%s1897_s29 + $0x8] sm:$0xff] }
 0x132   : > { %1515 = vpow2.f32 %v707_v17  ;;  %v697_v42 = vmul.f32 1.442695, %v675_v31  ;;  %v691_v37 = vmul.f32 1.442695, %v672_v12  ;;  %v663_v6 = vsub.f32 %v1998_v1, %v2001_v3  ;;  %v742_v32 = vld [vmem:[#allocation4 + $0x10] sm:$0xff]  ;;  %v743_v12 = vld [vmem:[#allocation4] sm:$0xff] }
 0x133   : > { %1517 = vpow2.f32 %v705_v23  ;;  %v695_v28 = vmul.f32 1.442695, %v674_v41  ;;  %v693_v18 = vmul.f32 1.442695, %v673_v14 }
 0x134   : > { %v2005_v22 = vpop.eup %1507  ;;  %1519 = vpow2.f32 %v703_v29  ;;  %v664_v9 = vmul.f32 1.442695, %v663_v6 }
 0x135   : > { %753 = vmatpush.msra.mxu1 %v2005_v22  ;;  %1378 = vmatpush.msrb.mxu3 %v2005_v22  ;;  %v2011_v27 = vpop.eup %1509  ;;  %1521 = vpow2.f32 %v701_v33 }
 0x136   : > { %v2017_v21 = vpop.eup %1511  ;;  %1523 = vpow2.f32 %v687_v38  ;;  %v745_v38 = vld [vmem:[#allocation4 + $0x8] sm:$0xff] }
 0x137   : > { %754 = vmatpush.msra.mxu1 %v2011_v27  ;;  %1379 = vmatpush.msrb.mxu3 %v2011_v27  ;;  %v2023_v39 = vpop.eup %1513  ;;  %1525 = vpow2.f32 %v685_v35 }
 0x138   : > { %v2029_v36 = vpop.eup %1515  ;;  %1527 = vpow2.f32 %v699_v40 }
 0x139   : > { %755 = vmatpush.msra.mxu1 %v2017_v21  ;;  %1380 = vmatpush.msrb.mxu3 %v2017_v21  ;;  %v2033_v43 = vpop.eup %1517  ;;  %1529 = vpow2.f32 %v689_v26 }
 0x13a   : > { %v2037_v44 = vpop.eup %1519  ;;  %1531 = vpow2.f32 %v697_v42 }
 0x13b   : > { %756 = vmatpush.msra.mxu1 %v2023_v39  ;;  %1381 = vmatpush.msrb.mxu3 %v2023_v39  ;;  %v2039_v45 = vpop.eup %1521  ;;  %1533 = vpow2.f32 %v691_v37  ;;  %v744_v37 = vld [vmem:[#allocation4 + $0x18] sm:$0xff] }
 0x13c   : > { %v2043_v46 = vpop.eup %1523  ;;  %1535 = vpow2.f32 %v695_v28 }
 0x13d   : > { %757 = vmatpush.msra.mxu1 %v2029_v36  ;;  %1382 = vmatpush.msrb.mxu3 %v2029_v36  ;;  %v2045_v47 = vpop.eup %1525  ;;  %1537 = vpow2.f32 %v693_v18 }
 0x13e   : > { %v2049_v48 = vpop.eup %1527  ;;  %v719_v49 = vadd.f32 %v2045_v47, %v2043_v46  ;;  %1539 = vpow2.f32 %v664_v9 }
 0x13f   : > { %758 = vmatpush.msra.mxu1 %v2033_v43  ;;  %1383 = vmatpush.msrb.mxu3 %v2033_v43  ;;  %v2053_v50 = vpop.eup %1529 }
 0x140   : > { %v2057_v51 = vpop.eup %1531  ;;  %v720_v52 = vadd.f32 %v2053_v50, %v719_v49 }
 0x141   : > { %759 = vmatpush.msra.mxu1 %v2037_v44  ;;  %1384 = vmatpush.msrb.mxu3 %v2037_v44  ;;  %v2060_v53 = vpop.eup %1533 }
 0x142   : > { %v2064_v55 = vpop.eup %1535  ;;  %v721_v54 = vadd.f32 %v2060_v53, %v720_v52 }
 0x143   : > { %760 = vmatpush.msra.mxu1 %v2039_v45  ;;  %1385 = vmatpush.msrb.mxu3 %v2039_v45  ;;  %v2067_v56 = vpop.eup %1537 }
 0x144   : > { %v722_v57 = vadd.f32 %v2067_v56, %v721_v54  ;;  %v1540_v19 = vpop.eup %1539 }
 0x145   : > { %761 = vmatpush.msra.mxu1 %v2049_v48  ;;  %1386 = vmatpush.msrb.mxu3 %v2049_v48  ;;  %v718_v1 = vmul.f32 %v1540_v19, %v717_v20  ;;  %v747_v29 = vperm.slane %v1540_v19, 0 }
 0x146   : > { %v723_v30 = vadd.f32 %v2064_v55, %v722_v57 }
 0x147   : > { %762 = vmatpush.msra.mxu1 %v2057_v51  ;;  %1387 = vmatpush.msrb.mxu3 %v2057_v51  ;;  %v749_v33 = vmul.f32 %v747_v29, %v742_v32  ;;  %v752_v35 = vmul.f32 %v747_v29, %v745_v38  ;;  %v750_v14 = vmul.f32 %v747_v29, %v743_v12 }
 0x148   : > { %v724_v58 = vadd.f32 %v2057_v51, %v723_v30  ;;  %v751_v28 = vmul.f32 %v747_v29, %v744_v37 }
 0x149   : > { %763 = vmatpush.msra.mxu1 %v2064_v55  ;;  %1388 = vmatpush.msrb.mxu3 %v2064_v55 }
 0x14a   : > { %v725_v59 = vadd.f32 %v2049_v48, %v724_v58 }
 0x14b   : > { %764 = vmatpush.msra.mxu1 %v2067_v56  ;;  %1389 = vmatpush.msrb.mxu3 %v2067_v56 }
 0x14c   : > { %v726_v62 = vadd.f32 %v2039_v45, %v725_v59 }
 0x14d   : > { %765 = vmatpush.msra.mxu1 %v2060_v53  ;;  %1390 = vmatpush.msrb.mxu3 %v2060_v53 }
 0x14e   : > { %v727_v63 = vadd.f32 %v2037_v44, %v726_v62 }
 0x14f   : > { %766 = vmatpush.msra.mxu1 %v2053_v50  ;;  %1391 = vmatpush.msrb.mxu3 %v2053_v50 }
 0x150   : > { %v728_v0 = vadd.f32 %v2033_v43, %v727_v63 }
 0x151   : > { %767 = vmatpush.msra.mxu1 %v2043_v46  ;;  %1392 = vmatpush.msrb.mxu3 %v2043_v46 }
 0x152   : > { %v729_v2 = vadd.f32 %v2029_v36, %v728_v0 }
 0x153   : > { %768 = vmatpush.msra.mxu1 %v2045_v47  ;;  %1393 = vmatpush.msrb.mxu3 %v2045_v47 }
 0x154   : > { %769 = vmatmul.f32.vlgmr.msra.gmra.mxu1 %v439_v60  ;;  %778 = vmatmul.f32.vlgmr.msrb.gmra.mxu3 %v442_v61  ;;  %v730_v5 = vadd.f32 %v2023_v39, %v729_v2 }
 0x156   : > { %v731_v7 = vadd.f32 %v2017_v21, %v730_v5 }
 0x158   : > { %v732_v8 = vadd.f32 %v2011_v27, %v731_v7 }
 0x15a   : > { %v733_v10 = vadd.f32 %v2005_v22, %v732_v8 }
 0x15c   : > { %772 = vmatmul.f32.gmra.mxu1 %v440_v4  ;;  %v734_v13 = vrot.slane %v733_v10, 4 }
 0x15e   : > { %v735_v15 = vadd.f32 %v734_v13, %v733_v10 }
 0x160   : > { %v736_v16 = vrot.slane %v735_v15, 2 }
 0x162   : > { %v737_v17 = vadd.f32 %v736_v16, %v735_v15 }
 0x164   : > { %775 = vmatmul.f32.gmra.mxu1 %v441_v11  ;;  %v738_v23 = vrot.slane %v737_v17, 1 }
 0x166   : > { %v739_v24 = vadd.f32 %v738_v23, %v737_v17 }
 0x168   : > { %v740_v25 = vadd.f32 %v739_v24, %v718_v1 }
 0x16a   : > { %741 = vst [vmem:[#allocation3] sm:$0x1] %v740_v25 }
 0x1d1   : > { %v770_v34 = vpop.f32.mrf.mxu1 }
 0x1d2   : > { %v782_v31 = vadd.f32 %v770_v34, %v749_v33 }
 0x1d4   : > { %786 = vst [vmem:[#allocation4 + $0x10] sm:$0xff] %v782_v31 }
 0x1d7   : > { %v779_v40 = vpop.f32.mrf.mxu3 }
 0x1d8   : > { %v785_v41 = vadd.f32 %v779_v40, %v752_v35 }
 0x1d9   : > { %v773_v26 = vpop.f32.mrf.mxu1 }
 0x1da   : > { %789 = vst [vmem:[#allocation4 + $0x8] sm:$0xff] %v785_v41  ;;  %v783_v42 = vadd.f32 %v773_v26, %v750_v14 }
 0x1dc   : > { %787 = vst [vmem:[#allocation4] sm:$0xff] %v783_v42 }
 0x1e0   : > { %793 = sbr.rel (%p1284_p8) target bundleno = 503 (0x1f7), region = 120 }
 0x1e1   : > { %v776_v18 = vpop.f32.mrf.mxu1 }
 0x1e2   : > { %v784_v49 = vadd.f32 %v776_v18, %v751_v28 }
 0x1e4   : > { %788 = vst [vmem:[#allocation4 + $0x18] sm:$0xff] %v784_v49 }
 0x1e5   : > { %794 = vst [vmem:[#allocation2] sm:$0x1] %v2001_v3 }
 0x1e6   : > { %796 = vst [vmem:[%s795_s0] sm:$0x1] %v2001_v3 }
 0x1e7   : > { %798 = vst [vmem:[%s797_s3] sm:$0xff] %v2045_v47 }
 0x1e8   : > { %799 = vst [vmem:[%s797_s3 + $0x8] sm:$0xff] %v2043_v46 }
 0x1e9   : > { %800 = vst [vmem:[%s797_s3 + $0x10] sm:$0xff] %v2053_v50 }
 0x1ea   : > { %801 = vst [vmem:[%s797_s3 + $0x18] sm:$0xff] %v2060_v53 }
 0x1eb   : > { %802 = vst [vmem:[%s797_s3 + $0x20] sm:$0xff] %v2067_v56 }
 0x1ec   : > { %803 = vst [vmem:[%s797_s3 + $0x28] sm:$0xff] %v2064_v55 }
 0x1ed   : > { %804 = vst [vmem:[%s797_s3 + $0x30] sm:$0xff] %v2057_v51 }
 0x1ee   : > { %805 = vst [vmem:[%s797_s3 + $0x38] sm:$0xff] %v2049_v48 }
 0x1ef   : > { %806 = vst [vmem:[%s797_s3 + $0x40] sm:$0xff] %v2039_v45 }
 0x1f0   : > { %807 = vst [vmem:[%s797_s3 + $0x48] sm:$0xff] %v2037_v44 }
 0x1f1   : > { %808 = vst [vmem:[%s797_s3 + $0x50] sm:$0xff] %v2033_v43 }
 0x1f2   : > { %809 = vst [vmem:[%s797_s3 + $0x58] sm:$0xff] %v2029_v36 }
 0x1f3   : > { %810 = vst [vmem:[%s797_s3 + $0x60] sm:$0xff] %v2023_v39 }
 0x1f4   : > { %811 = vst [vmem:[%s797_s3 + $0x68] sm:$0xff] %v2017_v21 }
 0x1f5   : > { %812 = vst [vmem:[%s797_s3 + $0x70] sm:$0xff] %v2011_v27 }
 0x1f6   : > { %813 = vst [vmem:[%s797_s3 + $0x78] sm:$0xff] %v2005_v22 }
 0x1f7 PF: > { %p1285_p9 = scmp.ne.s32.totalorder %s1683_s25, 3 }
 0x1f9   : > { %817 = sbr.rel (%p1285_p9) target bundleno = 596 (0x254), region = 124 }
 0x1fe   : > { %v818_v52 = vld [vmem:[#allocation3] sm:$0x1]  ;;  %v871_v54 = vld [vmem:[#allocation5] sm:$0x1]  ;;  %v823_v61 = vld [vmem:[#allocation4 + $0x10] sm:$0xff] }
 0x1ff   : > { %1541 = vrcp.f32 %v818_v52  ;;  %v872_v58 = vsub.f32 %v871_v54, %v2001_v3  ;;  %v824_v62 = vld [vmem:[#allocation4] sm:$0xff]  ;;  %v825_v63 = vld [vmem:[#allocation4 + $0x18] sm:$0xff]  ;;  %v826_v4 = vld [vmem:[#allocation4 + $0x8] sm:$0xff] }
 0x200   : > { %v928_v16 = vld [vmem:[#allocation5 + $0x1] sm:$0x1]  ;;  %v876_v24 = vld [vmem:[%s1901_s15] sm:$0xff]  ;;  %v882_v34 = vld [vmem:[%s1901_s15 + $0x30] sm:$0xff] }
 0x201   : > { %v873_v0 = vmul.f32 1.442695, %v872_v58  ;;  %v883_v38 = vld [vmem:[%s1901_s15 + $0x38] sm:$0xff]  ;;  %v884_v41 = vld [vmem:[%s1901_s15 + $0x40] sm:$0xff]  ;;  %v885_v26 = vld [vmem:[%s1901_s15 + $0x48] sm:$0xff] }
 0x202   : > { %v986_v12 = vld [vmem:[#allocation5 + $0x2] sm:$0x1]  ;;  %v886_v37 = vld [vmem:[%s1901_s15 + $0x50] sm:$0xff] }
 0x203   : > { %1543 = vpow2.f32 %v873_v0  ;;  %v987_v28 = vsub.f32 %v986_v12, %v2001_v3  ;;  %v887_v49 = vld [vmem:[%s1901_s15 + $0x58] sm:$0xff] }
 0x204   : > { %v1337_v12 = vld [vmem:[%s1901_s15 + $0x118] sm:$0xff] }
 0x205   : > { %v1542_v57 = vpop.eup %1541 }
 0x206   : > { %v820_v30 = vmul.f32 %v1542_v57, %v818_v52 }
 0x208   : > { %v821_v59 = vsub.f32 2.0, %v820_v30 }
 0x209   : > { %v1544_v17 = vpop.eup %1543 }
 0x20a   : > { %v2124_v60 = vmul.f32 %v1542_v57, %v821_v59  ;;  %v888_v57 = vld [vmem:[%s1901_s15 + $0x60] sm:$0xff]  ;;  %v890_v59 = vld [vmem:[%s1901_s15 + $0x70] sm:$0xff] }
 0x20c   : > { %v828_v2 = vperm.slane %v2124_v60, 0  ;;  %v875_v19 = vmul.f32 %v1544_v17, %v2124_v60 }
 0x20e   : > { %v830_v5 = vmul.f32 %v828_v2, %v823_v61  ;;  %v831_v6 = vmul.f32 %v828_v2, %v824_v62  ;;  %v832_v7 = vmul.f32 %v828_v2, %v825_v63  ;;  %v833_v8 = vmul.f32 %v828_v2, %v826_v4  ;;  %v891_v63 = vld [vmem:[%s1901_s15 + $0x78] sm:$0xff]  ;;  %v1302_v4 = vld [vmem:[%s1901_s15 + $0x80] sm:$0xff] }
 0x20f   : > { %v838_v9 = vmul.f32 %v2045_v47, %v828_v2  ;;  %v839_v10 = vmul.f32 %v2043_v46, %v828_v2  ;;  %v840_v11 = vmul.f32 %v2053_v50, %v828_v2  ;;  %v841_v13 = vmul.f32 %v2060_v53, %v828_v2 }
 0x210   : > { %834 = vst [vmem:[%s1899_s21] sm:$0xff] %v830_v5  ;;  %v842_v15 = vmul.f32 %v2067_v56, %v828_v2  ;;  %v843_v47 = vmul.f32 %v2064_v55, %v828_v2  ;;  %v844_v46 = vmul.f32 %v2057_v51, %v828_v2  ;;  %v845_v50 = vmul.f32 %v2049_v48, %v828_v2 }
 0x211   : > { %835 = vst [vmem:[%s1899_s21 + $0x8] sm:$0xff] %v831_v6  ;;  %v929_v53 = vsub.f32 %v928_v16, %v2001_v3  ;;  %v846_v56 = vmul.f32 %v2039_v45, %v828_v2  ;;  %v847_v55 = vmul.f32 %v2037_v44, %v828_v2  ;;  %v848_v51 = vmul.f32 %v2033_v43, %v828_v2  ;;  %v889_v3 = vld [vmem:[%s1901_s15 + $0x68] sm:$0xff] }
 0x212   : > { %836 = vst [vmem:[%s1899_s21 + $0x10] sm:$0xff] %v832_v7  ;;  %v849_v48 = vmul.f32 %v2029_v36, %v828_v2  ;;  %v850_v45 = vmul.f32 %v2023_v39, %v828_v2  ;;  %v2155_v23 = vperm.slane %v875_v19, 0  ;;  %v851_v44 = vmul.f32 %v2017_v21, %v828_v2  ;;  %v877_v36 = vld [vmem:[%s1901_s15 + $0x8] sm:$0xff]  ;;  %v878_v39 = vld [vmem:[%s1901_s15 + $0x10] sm:$0xff]  ;;  %v879_v21 = vld [vmem:[%s1901_s15 + $0x18] sm:$0xff] }
 0x213   : > { %837 = vst [vmem:[%s1899_s21 + $0x18] sm:$0xff] %v833_v8  ;;  %v930_v20 = vmul.f32 1.442695, %v929_v53  ;;  %v852_v43 = vmul.f32 %v2011_v27, %v828_v2  ;;  %v853_v1 = vmul.f32 %v2005_v22, %v828_v2  ;;  %v880_v27 = vld [vmem:[%s1901_s15 + $0x20] sm:$0xff]  ;;  %v881_v22 = vld [vmem:[%s1901_s15 + $0x28] sm:$0xff]  ;;  %v1304_v8 = vld [vmem:[%s1901_s15 + $0x90] sm:$0xff] }
 0x214   : > { %1286 = vst [vmem:[%s1901_s15 + $0x180] sm:$0xff] %v838_v9  ;;  %v895_v25 = vmul.f32 %v2155_v23, %v876_v24  ;;  %v896_v29 = vmul.f32 %v2155_v23, %v877_v36  ;;  %v897_v32 = vmul.f32 %v2155_v23, %v878_v39  ;;  %v898_v33 = vmul.f32 %v2155_v23, %v879_v21  ;;  %v1303_v6 = vld [vmem:[%s1901_s15 + $0x88] sm:$0xff]  ;;  %v1310_v19 = vld [vmem:[%s1901_s15 + $0xc0] sm:$0xff] }
 0x215   : > { %1287 = vst [vmem:[%s1901_s15 + $0x188] sm:$0xff] %v839_v10  ;;  %1545 = vpow2.f32 %v930_v20  ;;  %v899_v31 = vmul.f32 %v2155_v23, %v880_v27  ;;  %v900_v40 = vmul.f32 %v2155_v23, %v881_v22  ;;  %v901_v14 = vmul.f32 %v2155_v23, %v882_v34  ;;  %v1305_v10 = vld [vmem:[%s1901_s15 + $0x98] sm:$0xff]  ;;  %v1307_v16 = vld [vmem:[%s1901_s15 + $0xa8] sm:$0xff]  ;;  %v1312_v20 = vld [vmem:[%s1901_s15 + $0xd0] sm:$0xff] }
 0x216   : > { %1288 = vst [vmem:[%s1901_s15 + $0x190] sm:$0xff] %v840_v11  ;;  %v902_v42 = vmul.f32 %v2155_v23, %v883_v38  ;;  %v903_v18 = vmul.f32 %v2155_v23, %v884_v41  ;;  %v904_v54 = vmul.f32 %v2155_v23, %v885_v26  ;;  %v905_v30 = vmul.f32 %v2155_v23, %v886_v37 }
 0x217   : > { %1289 = vst [vmem:[%s1901_s15 + $0x198] sm:$0xff] %v841_v13  ;;  %v906_v58 = vmul.f32 %v2155_v23, %v887_v49  ;;  %v988_v61 = vmul.f32 1.442695, %v987_v28  ;;  %v907_v62 = vmul.f32 %v2155_v23, %v888_v57  ;;  %v908_v2 = vmul.f32 %v2155_v23, %v889_v3  ;;  %v1306_v13 = vld [vmem:[%s1901_s15 + $0xa0] sm:$0xff]  ;;  %v1341_v28 = vld [vmem:[%s1901_s15 + $0x138] sm:$0xff] }
 0x218   : > { %1290 = vst [vmem:[%s1901_s15 + $0x1a0] sm:$0xff] %v842_v15  ;;  %v909_v5 = vmul.f32 %v2155_v23, %v890_v59  ;;  %v910_v7 = vmul.f32 %v2155_v23, %v891_v63  ;;  %v1313_v23 = vld [vmem:[%s1901_s15 + $0xd8] sm:$0xff]  ;;  %v1342_v49 = vld [vmem:[%s1901_s15 + $0x140] sm:$0xff]  ;;  %v1347_v63 = vld [vmem:[%s1901_s15 + $0x168] sm:$0xff] }
 0x219   : > { %1291 = vst [vmem:[%s1901_s15 + $0x1a8] sm:$0xff] %v843_v47  ;;  %1547 = vpow2.f32 %v988_v61  ;;  %v1308_v47 = vld [vmem:[%s1901_s15 + $0xb0] sm:$0xff]  ;;  %v1346_v61 = vld [vmem:[%s1901_s15 + $0x160] sm:$0xff] }
 0x21a   : > { %1292 = vst [vmem:[%s1901_s15 + $0x1b0] sm:$0xff] %v844_v46 }
 0x21b   : > { %1293 = vst [vmem:[%s1901_s15 + $0x1b8] sm:$0xff] %v845_v50  ;;  %v1546_v35 = vpop.eup %1545  ;;  %v1309_v50 = vld [vmem:[%s1901_s15 + $0xb8] sm:$0xff] }
 0x21c   : > { %1294 = vst [vmem:[%s1901_s15 + $0x1c0] sm:$0xff] %v846_v56  ;;  %v932_v52 = vmul.f32 %v1546_v35, %v2124_v60 }
 0x21d   : > { %1295 = vst [vmem:[%s1901_s15 + $0x1c8] sm:$0xff] %v847_v55 }
 0x21e   : > { %1296 = vst [vmem:[%s1901_s15 + $0x1d0] sm:$0xff] %v848_v51  ;;  %v951_v0 = vperm.slane %v932_v52, 0  ;;  %v1311_v51 = vld [vmem:[%s1901_s15 + $0xc8] sm:$0xff] }
 0x21f   : > { %1297 = vst [vmem:[%s1901_s15 + $0x1d8] sm:$0xff] %v849_v48  ;;  %v1548_v53 = vpop.eup %1547 }
 0x220   : > { %1298 = vst [vmem:[%s1901_s15 + $0x1e0] sm:$0xff] %v850_v45  ;;  %v953_v9 = vmul.f32 %v1302_v4, %v951_v0  ;;  %v954_v11 = vmul.f32 %v1303_v6, %v951_v0  ;;  %v955_v15 = vmul.f32 %v1304_v8, %v951_v0  ;;  %v956_v17 = vmul.f32 %v1305_v10, %v951_v0 }
 0x221   : > { %1299 = vst [vmem:[%s1901_s15 + $0x1e8] sm:$0xff] %v851_v44  ;;  %v957_v46 = vmul.f32 %v1306_v13, %v951_v0  ;;  %v958_v56 = vmul.f32 %v1307_v16, %v951_v0  ;;  %v959_v55 = vmul.f32 %v1308_v47, %v951_v0  ;;  %v960_v48 = vmul.f32 %v1309_v50, %v951_v0 }
 0x222   : > { %1300 = vst [vmem:[%s1901_s15 + $0x1f0] sm:$0xff] %v852_v43  ;;  %v961_v45 = vmul.f32 %v1310_v19, %v951_v0  ;;  %v990_v44 = vmul.f32 %v1548_v53, %v2124_v60  ;;  %v962_v24 = vmul.f32 %v1311_v51, %v951_v0  ;;  %v1314_v43 = vld [vmem:[%s1901_s15 + $0xe0] sm:$0xff]  ;;  %v963_v36 = vmul.f32 %v1312_v20, %v951_v0  ;;  %v1317_v60 = vld [vmem:[%s1901_s15 + $0xf8] sm:$0xff] }
 0x223   : > { %1301 = vst [vmem:[%s1901_s15 + $0x1f8] sm:$0xff] %v853_v1  ;;  %v1315_v1 = vld [vmem:[%s1901_s15 + $0xe8] sm:$0xff]  ;;  %v964_v39 = vmul.f32 %v1313_v23, %v951_v0  ;;  %v965_v21 = vmul.f32 %v1314_v43, %v951_v0  ;;  %v968_v34 = vmul.f32 %v1317_v60, %v951_v0 }
 0x224   : > { %911 = vst [vmem:[%s1901_s15] sm:$0xff] %v895_v25  ;;  %v1316_v25 = vld [vmem:[%s1901_s15 + $0xf0] sm:$0xff]  ;;  %v966_v27 = vmul.f32 %v1315_v1, %v951_v0 }
 0x225   : > { %912 = vst [vmem:[%s1901_s15 + $0x8] sm:$0xff] %v896_v29  ;;  %v1009_v29 = vperm.slane %v990_v44, 0  ;;  %v967_v22 = vmul.f32 %v1316_v25, %v951_v0 }
 0x226   : > { %913 = vst [vmem:[%s1901_s15 + $0x10] sm:$0xff] %v897_v32  ;;  %v1334_v32 = vld [vmem:[%s1901_s15 + $0x100] sm:$0xff] }
 0x227   : > { %914 = vst [vmem:[%s1901_s15 + $0x18] sm:$0xff] %v898_v33  ;;  %v1335_v33 = vld [vmem:[%s1901_s15 + $0x108] sm:$0xff]  ;;  %v1011_v38 = vmul.f32 %v1334_v32, %v1009_v29  ;;  %v1014_v26 = vmul.f32 %v1337_v12, %v1009_v29  ;;  %v1018_v57 = vmul.f32 %v1341_v28, %v1009_v29  ;;  %v1019_v3 = vmul.f32 %v1342_v49, %v1009_v29 }
 0x228   : > { %915 = vst [vmem:[%s1901_s15 + $0x20] sm:$0xff] %v899_v31  ;;  %v1336_v31 = vld [vmem:[%s1901_s15 + $0x110] sm:$0xff]  ;;  %v1012_v35 = vmul.f32 %v1335_v33, %v1009_v29  ;;  %v1023_v4 = vmul.f32 %v1346_v61, %v1009_v29  ;;  %v1024_v6 = vmul.f32 %v1347_v63, %v1009_v29 }
 0x229   : > { %916 = vst [vmem:[%s1901_s15 + $0x28] sm:$0xff] %v900_v40  ;;  %v1338_v40 = vld [vmem:[%s1901_s15 + $0x120] sm:$0xff]  ;;  %v1013_v41 = vmul.f32 %v1336_v31, %v1009_v29 }
 0x22a   : > { %917 = vst [vmem:[%s1901_s15 + $0x30] sm:$0xff] %v901_v14  ;;  %v1339_v14 = vld [vmem:[%s1901_s15 + $0x128] sm:$0xff]  ;;  %v1015_v37 = vmul.f32 %v1338_v40, %v1009_v29 }
 0x22b   : > { %918 = vst [vmem:[%s1901_s15 + $0x38] sm:$0xff] %v902_v42  ;;  %v1340_v42 = vld [vmem:[%s1901_s15 + $0x130] sm:$0xff] }
 0x22c   : > { %919 = vst [vmem:[%s1901_s15 + $0x40] sm:$0xff] %v903_v18  ;;  %v1016_v18 = vmul.f32 %v1339_v14, %v1009_v29  ;;  %v1017_v52 = vmul.f32 %v1340_v42, %v1009_v29 }
 0x22d   : > { %920 = vst [vmem:[%s1901_s15 + $0x48] sm:$0xff] %v904_v54  ;;  %v1343_v54 = vld [vmem:[%s1901_s15 + $0x148] sm:$0xff] }
 0x22e   : > { %921 = vst [vmem:[%s1901_s15 + $0x50] sm:$0xff] %v905_v30  ;;  %v1344_v30 = vld [vmem:[%s1901_s15 + $0x150] sm:$0xff]  ;;  %v1020_v59 = vmul.f32 %v1343_v54, %v1009_v29 }
 0x22f   : > { %922 = vst [vmem:[%s1901_s15 + $0x58] sm:$0xff] %v906_v58  ;;  %v1345_v58 = vld [vmem:[%s1901_s15 + $0x158] sm:$0xff] }
 0x230   : > { %923 = vst [vmem:[%s1901_s15 + $0x60] sm:$0xff] %v907_v62  ;;  %v1021_v62 = vmul.f32 %v1344_v30, %v1009_v29  ;;  %v1022_v0 = vmul.f32 %v1345_v58, %v1009_v29 }
 0x231   : > { %924 = vst [vmem:[%s1901_s15 + $0x68] sm:$0xff] %v908_v2  ;;  %v1348_v2 = vld [vmem:[%s1901_s15 + $0x170] sm:$0xff] }
 0x232   : > { %925 = vst [vmem:[%s1901_s15 + $0x70] sm:$0xff] %v909_v5  ;;  %v1349_v5 = vld [vmem:[%s1901_s15 + $0x178] sm:$0xff] }
 0x233   : > { %926 = vst [vmem:[%s1901_s15 + $0x78] sm:$0xff] %v910_v7  ;;  %v1025_v7 = vmul.f32 %v1348_v2, %v1009_v29  ;;  %v1026_v8 = vmul.f32 %v1349_v5, %v1009_v29 }
 0x234   : > { %1318 = vst [vmem:[%s1901_s15 + $0x80] sm:$0xff] %v953_v9 }
 0x235   : > { %1319 = vst [vmem:[%s1901_s15 + $0x88] sm:$0xff] %v954_v11 }
 0x236   : > { %1320 = vst [vmem:[%s1901_s15 + $0x90] sm:$0xff] %v955_v15 }
 0x237   : > { %1321 = vst [vmem:[%s1901_s15 + $0x98] sm:$0xff] %v956_v17 }
 0x238   : > { %1322 = vst [vmem:[%s1901_s15 + $0xa0] sm:$0xff] %v957_v46 }
 0x239   : > { %1323 = vst [vmem:[%s1901_s15 + $0xa8] sm:$0xff] %v958_v56 }
 0x23a   : > { %1324 = vst [vmem:[%s1901_s15 + $0xb0] sm:$0xff] %v959_v55 }
 0x23b   : > { %1325 = vst [vmem:[%s1901_s15 + $0xb8] sm:$0xff] %v960_v48 }
 0x23c   : > { %1326 = vst [vmem:[%s1901_s15 + $0xc0] sm:$0xff] %v961_v45 }
 0x23d   : > { %1327 = vst [vmem:[%s1901_s15 + $0xc8] sm:$0xff] %v962_v24 }
 0x23e   : > { %1328 = vst [vmem:[%s1901_s15 + $0xd0] sm:$0xff] %v963_v36 }
 0x23f   : > { %1329 = vst [vmem:[%s1901_s15 + $0xd8] sm:$0xff] %v964_v39 }
 0x240   : > { %1330 = vst [vmem:[%s1901_s15 + $0xe0] sm:$0xff] %v965_v21 }
 0x241   : > { %1331 = vst [vmem:[%s1901_s15 + $0xe8] sm:$0xff] %v966_v27 }
 0x242   : > { %1332 = vst [vmem:[%s1901_s15 + $0xf0] sm:$0xff] %v967_v22 }
 0x243   : > { %1333 = vst [vmem:[%s1901_s15 + $0xf8] sm:$0xff] %v968_v34 }
 0x244   : > { %1350 = vst [vmem:[%s1901_s15 + $0x100] sm:$0xff] %v1011_v38 }
 0x245   : > { %1351 = vst [vmem:[%s1901_s15 + $0x108] sm:$0xff] %v1012_v35 }
 0x246   : > { %1352 = vst [vmem:[%s1901_s15 + $0x110] sm:$0xff] %v1013_v41 }
 0x247   : > { %1353 = vst [vmem:[%s1901_s15 + $0x118] sm:$0xff] %v1014_v26 }
 0x248   : > { %1354 = vst [vmem:[%s1901_s15 + $0x120] sm:$0xff] %v1015_v37 }
 0x249   : > { %1355 = vst [vmem:[%s1901_s15 + $0x128] sm:$0xff] %v1016_v18 }
 0x24a   : > { %1356 = vst [vmem:[%s1901_s15 + $0x130] sm:$0xff] %v1017_v52 }
 0x24b   : > { %1357 = vst [vmem:[%s1901_s15 + $0x138] sm:$0xff] %v1018_v57 }
 0x24c   : > { %1358 = vst [vmem:[%s1901_s15 + $0x140] sm:$0xff] %v1019_v3 }
 0x24d   : > { %1359 = vst [vmem:[%s1901_s15 + $0x148] sm:$0xff] %v1020_v59 }
 0x24e   : > { %1360 = vst [vmem:[%s1901_s15 + $0x150] sm:$0xff] %v1021_v62 }
 0x24f   : > { %1361 = vst [vmem:[%s1901_s15 + $0x158] sm:$0xff] %v1022_v0 }
 0x250   : > { %1362 = vst [vmem:[%s1901_s15 + $0x160] sm:$0xff] %v1023_v4 }
 0x251   : > { %1363 = vst [vmem:[%s1901_s15 + $0x168] sm:$0xff] %v1024_v6 }
 0x252   : > { %1364 = vst [vmem:[%s1901_s15 + $0x170] sm:$0xff] %v1025_v7 }
 0x253   : > { %1365 = vst [vmem:[%s1901_s15 + $0x178] sm:$0xff] %v1026_v8 }
 0x254 PF: > { %s1368_s25 = sshll.u32 %s1691_s27, 3  ;;  %s1062_s8 = sshll.u32 %s1899_s21, 4  ;;  %s1063_s8 = int_to_ptr.vmem [resolvable:$true] %s1062_s8 }
 0x255   : > { %s1059_s29 = sadd.s32 %s1687_s26, %s1368_s25  ;;  %s1044_s19 = scalar_lea.sflag [#allocation10], %s1883_s28 }
 0x256   : > { %s1369_s11 = sshll.u32 %s1059_s29, 3  ;;  %s1569_s21 = scalar_lea.hbm %s2362_s4, 128 }
 0x257   : > { %s1061_s17 = scalar_lea.hbm %s2362_s4, %s1369_s11 }
 0x258   : > { %s1064_s10 = sshll.u32 %s1061_s17, 4  ;;  %s1065_s10 = int_to_ptr.hbm [resolvable:$true] %s1064_s10 }
 0x259   : > { %s1563_s14 = sshra.s32 %s1065_s10, 4  ;;  %s1564_s14 = int_to_ptr.hbm [resolvable:$true] %s1563_s14 }
 0x25a   : > { %s1565_s9 = scalar_lea.hbm %s1564_s14, 32  ;;  %p1570_p2 = scmp.lt.s32.totalorder %s1564_s14, %s2362_s4 }
 0x25b   : > { %p1566_p10 = scmp.ne.s32.totalorder %s1564_s14, %s1565_s9  ;;  %p1571_p1 = scmp.lt.s32.totalorder %s1569_s21, %s1565_s9 }
 0x25d   : > { %p1567_p13 = pnand %p1566_p10, %p1846_p11  ;;  %p1572_p3 = por %p1571_p1, %p1570_p2 }
 0x25f   : > { %p1568_p0 = pneg %p1567_p13 }
 0x261   : > { %p1573_p4 = pnand %p1572_p3, %p1568_p0 }
 0x263   : > { %1576 = shalt.err (!%p1573_p4)
}
 0x264   : > { %s1711_s0 = smov 128   ;;  %s1712_s25 = smov 256  }
 0x265   : > { %s1713_s29 = smov 8   ;;  %s1370_s11 = sshll.u32 %s1691_s27, 7 }
 0x266   : > { %1394 = dma.vmem_to_hbm [thread:$0]  (%p1846_p11), %s1063_s8, 512, %s1065_s10, %s1044_s19, %s1711_s0, %s1712_s25, %s1713_s29  }
 0x267   : > { %s1077_s18 = sadd.s32 %s1687_s26, %s1370_s11  ;;  %s1080_s13 = sshll.u32 %s1901_s15, 4  ;;  %s1081_s13 = int_to_ptr.vmem [resolvable:$true] %s1080_s13 }
 0x268   : > { %s1371_s17 = sshll.u32 %s1077_s18, 3  ;;  %s1049_s21 = scalar_lea.sflag [#allocation12], %s1883_s28 }
 0x269   : > { %s1079_s12 = scalar_lea.hbm %s2363_s5, %s1371_s17  ;;  %s1597_s26 = scalar_lea.hbm %s2363_s5, 2048 }
 0x26a   : > { %s1082_s20 = sshll.u32 %s1079_s12, 4  ;;  %s1083_s20 = int_to_ptr.hbm [resolvable:$true] %s1082_s20 }
 0x26b   : > { %s1591_s2 = sshra.s32 %s1083_s20, 4  ;;  %s1592_s2 = int_to_ptr.hbm [resolvable:$true] %s1591_s2 }
 0x26c   : > { %s1593_s3 = scalar_lea.hbm %s1592_s2, 512  ;;  %p1598_p8 = scmp.lt.s32.totalorder %s1592_s2, %s2363_s5 }
 0x26d   : > { %p1594_p5 = scmp.ne.s32.totalorder %s1592_s2, %s1593_s3  ;;  %p1599_p9 = scmp.lt.s32.totalorder %s1597_s26, %s1593_s3 }
 0x26f   : > { %p1595_p6 = pnand %p1594_p5, %p1846_p11  ;;  %p1600_p10 = por %p1599_p9, %p1598_p8 }
 0x271   : > { %p1596_p7 = pneg %p1595_p6 }
 0x273   : > { %p1601_p13 = pnand %p1600_p10, %p1596_p7 }
 0x275   : > { %1604 = shalt.err (!%p1601_p13)
}
 0x276   : > { %1395 = dma.vmem_to_hbm [thread:$0]  (%p1846_p11), %s1081_s13, 8192, %s1083_s20, %s1049_s21, %s1711_s0, %s1712_s25, %s1713_s29  }
 0x277 PF: > { %s2388_s28 = sld [smem:[#allocation15_spill]]  ;;  %p1405_p0 = scmp.ge.s32.totalorder %s1707_s30, 2 }
 0x279   : > { %p1399_p2 = pnand %p1405_p0, %p1850_p12 }
 0x27b   : > { %p1400_p1 = pneg %p1399_p2 }
 0x27d   : > { %s1097_s11 = sand.u32 1, %s2388_s28  }
 0x27e   : > { %s1098_s18 = scalar_lea.sflag [#allocation10], %s1097_s11 }
 0x27f   : > { %1654 = dma.done.wait (%p1400_p1), %s1098_s18, 512  }
 0x280   : > { %1656 = vsyncadd (%p1400_p1), %s1098_s18, 4294966784  ;;  %s1108_s17 = scalar_lea.sflag [#allocation12], %s1097_s11 }
 0x281   : > { %1658 = dma.done.wait (%p1400_p1), %s1108_s17, 8192  }
 0x282   : > { %1660 = vsyncadd (%p1400_p1), %s1108_s17, 4294959104  ;;  %s23_s30 = sadd.s32 1, %s1707_s30   ;;  %s2390_s25 = sld [smem:[#allocation16_spill]] }
 0x283   : > { %p20_p3 = scmp.ge.s32.totalorder %s23_s30, 18   ;;  %s2391_s26 = sld [smem:[#allocation17_spill]] }
 0x284   : > { %s2392_s27 = sld [smem:[#allocation18_spill]]  ;;  %s2396_s20 = smov %s1675_s23 }
 0x285   : > { %s2393_s0 = sld [smem:[#allocation19_spill]]  ;;  %s2397_s21 = smov %s1671_s22 }
 0x286   : > { %s2394_s28 = sld [smem:[#allocation20_spill]]  ;;  %s2398_s22 = smov %s1861_s7 }
 0x287   : > { %s2395_s29 = sld [smem:[#allocation21_spill]]  ;;  %s2399_s23 = smov %s1679_s24 }
 0x288   : > { %s2400_s24 = smov %s1858_s6  ;;  %22 = sbr.rel (!%p20_p3) target bundleno = 13 (0xd), region = 199 }
 0x28d   :  { %1114 = vsyncpa [#allocation10], 1 }
 0x28e   :  { %1116 = vsyncpa [#allocation10 + $0x1], 1 }
 0x28f   :  { %1117 = vsyncpa [#allocation12], 1 }
 0x290   :  { %1119 = vsyncpa [#allocation12 + $0x1], 1 }

</bundles_post_ra>
